<compile_context>
chip_gen: v6e
topology: v6e:2x2x1
jax: 0.10.0
libtpu: 0.0.40
codegen_flags: <defaults>
</compile_context>

<pallas_src>
import math

import jax
import jax.numpy as jnp
from jax.experimental import pallas as pl
from jax.experimental.pallas import tpu as pltpu

# ---- small config consistent with the SatCLIP location encoder -------------
B = 8                # batch of (lon, lat) coordinates
L = 4                # spherical-harmonic degree  (ckpt uses L=40)
N_FEAT = L * L       # 16 positional features
HIDDEN = 64          # SIREN hidden width         (ckpt uses 256)
EMBED = 32           # embedding dim              (ckpt uses 256)
ADD_MULTIPLES = 3    # DummyEnc(add_multiples=3)
W0_FIRST = 30.0      # SIREN w0_initial
W0 = 1.0             # SIREN w0

PAD = 128            # lane width: all feature dims zero-padded to this
TB = 8               # batch tile (rows per grid step)


# --------------------------- spherical harmonics -----------------------------
def _double_fact(n):
    out = 1
    for k in range(n, 0, -2):
        out *= k
    return float(out)


def _sh_features(ct, st, phi):
    """Real spherical harmonics Y_lm for l < L as a list of L*L jnp arrays.

    Works on any broadcastable jnp arrays (used both inside the kernel on
    [TB, 1] tiles and in the plain-JAX reference). Static Python recurrences.
    """
    P = {(0, 0): jnp.ones_like(ct)}
    for m in range(1, L):
        P[(m, m)] = ((-1.0) ** m) * _double_fact(2 * m - 1) * st ** m
    for m in range(0, L - 1):
        P[(m + 1, m)] = (2 * m + 1) * ct * P[(m, m)]
    for m in range(0, L):
        for l in range(m + 2, L):
            P[(l, m)] = ((2 * l - 1) * ct * P[(l - 1, m)]
                         - (l + m - 1) * P[(l - 2, m)]) / (l - m)

    feats = []
    for l in range(L):
        for m in range(-l, l + 1):
            am = abs(m)
            norm = math.sqrt((2 * l + 1) / (4.0 * math.pi)
                             * math.factorial(l - am) / math.factorial(l + am))
            if m == 0:
                feats.append(norm * P[(l, 0)])
            elif m > 0:
                feats.append(math.sqrt(2.0) * norm * P[(l, am)] * jnp.cos(am * phi))
            else:
                feats.append(math.sqrt(2.0) * norm * P[(l, am)] * jnp.sin(am * phi))
    return feats


# ------------------------------- Pallas kernel -------------------------------
def dummy_enc_kernel(x_ref, w_ref, b_ref, out_ref):
    """Fused: lon/lat -> SH posenc -> SIREN MLP -> channel-concat.

    x_ref:   [TB, 2]        raw (lon_deg, lat_deg)
    w_ref:   [3, PAD, PAD]  packed {w1*W0_FIRST, w2*W0, tile(w3,3)}, zero-padded
    b_ref:   [8, PAD]       rows 0..2 = {b1*W0_FIRST, b2*W0, tile(b3,3)}, zero-padded
    out_ref: [TB, PAD]      first EMBED*ADD_MULTIPLES lanes valid, rest zero
    """
    x = x_ref[...].astype(jnp.float32)                       # [TB, 2]
    lon = x[:, 0:1] * (math.pi / 180.0)                      # [TB, 1] radians
    lat = x[:, 1:2] * (math.pi / 180.0)
    theta = (math.pi / 2.0) - lat                            # colatitude
    ct, st, phi = jnp.cos(theta), jnp.sin(theta), lon

    feats = _sh_features(ct, st, phi)                        # N_FEAT x [TB, 1]

    # ---- layer 1: broadcast-MAC over the 16 SH features (VPU). Avoids an
    # under-utilised K=16 MXU pass and any lane-axis concat of the posenc.
    w1 = w_ref[0]                                            # [PAD, PAD]
    acc = feats[0] * w1[0:1, :]                              # [TB,1]*[1,PAD] -> [TB,PAD]
    for f in range(1, N_FEAT):
        acc = acc + feats[f] * w1[f:f + 1, :]
    h = jnp.sin(acc + b_ref[0:1, :])                         # W0_FIRST folded at init

    # ---- layer 2 (MXU). bf16 operands + f32 accum is the win at ckpt widths.
    h = jnp.sin(jnp.dot(h, w_ref[1], preferred_element_type=jnp.float32)
                + b_ref[1:2, :])

    # ---- layer 3: w3/b3 columns pre-replicated ADD_MULTIPLES times, so this
    # single matmul emits torch.cat([emb]*ADD_MULTIPLES, dim=1) directly.
    out = jnp.dot(h, w_ref[2], preferred_element_type=jnp.float32) + b_ref[2:3, :]
    out_ref[...] = out.astype(out_ref.dtype)                 # one unmasked 128-lane store


def dummy_enc_forward(x, w_packed, b_packed):
    """x: [B, 2] (lon_deg, lat_deg) -> [B, EMBED * ADD_MULTIPLES]."""
    nb = x.shape[0]
    grid = (pl.cdiv(nb, TB),)
    out = pl.pallas_call(
        dummy_enc_kernel,
        out_shape=jax.ShapeDtypeStruct((nb, PAD), jnp.float32),
        grid_spec=pltpu.PrefetchScalarGridSpec(
            num_scalar_prefetch=0,
            grid=grid,
            in_specs=[
                pl.BlockSpec((TB, 2), lambda i: (i, 0)),          # batch-tiled coords
                pl.BlockSpec((3, PAD, PAD), lambda i: (0, 0, 0)),  # weights stay resident
                pl.BlockSpec((8, PAD), lambda i: (0, 0)),          # biases stay resident
            ],
            out_specs=pl.BlockSpec((TB, PAD), lambda i: (i, 0)),
        ),
        compiler_params=pltpu.CompilerParams(
            dimension_semantics=("parallel",)),                   # shards across v7x's 2 TCs
    )(x, w_packed, b_packed)
    return out[:, :EMBED * ADD_MULTIPLES]                         # drop lane padding


# ---------------------- deterministic parameter init ------------------------
def init_params(key):
    k1, k2, k3 = jax.random.split(key, 3)

    def siren_uniform(k, fan_in, shape, w0, first):
        bound = (1.0 / fan_in) if first else (math.sqrt(6.0 / fan_in) / w0)
        return jax.random.uniform(k, shape, jnp.float32, -bound, bound)

    w1 = siren_uniform(k1, N_FEAT, (N_FEAT, HIDDEN), W0_FIRST, first=True)
    b1 = siren_uniform(jax.random.fold_in(k1, 1), N_FEAT, (1, HIDDEN), W0_FIRST, first=True)
    w2 = siren_uniform(k2, HIDDEN, (HIDDEN, HIDDEN), W0, first=False)
    b2 = siren_uniform(jax.random.fold_in(k2, 1), HIDDEN, (1, HIDDEN), W0, first=False)
    w3 = siren_uniform(k3, HIDDEN, (HIDDEN, EMBED), W0, first=False)
    b3 = siren_uniform(jax.random.fold_in(k3, 1), HIDDEN, (1, EMBED), W0, first=False)
    return (w1, b1, w2, b2, w3, b3)


def pack_params(w1, b1, w2, b2, w3, b3):
    """Fold w0 scales, replicate the output layer for the concat, pad to 128
    lanes, and pack into 2 buffers (one weights, one biases). Done once at init."""
    w1s, b1s = w1 * W0_FIRST, b1 * W0_FIRST
    w2s, b2s = w2 * W0, b2 * W0
    w3t = jnp.concatenate([w3] * ADD_MULTIPLES, axis=1)           # [HIDDEN, 96]
    b3t = jnp.concatenate([b3] * ADD_MULTIPLES, axis=1)           # [1, 96]

    def pad2(a):
        return jnp.zeros((PAD, PAD), jnp.float32).at[:a.shape[0], :a.shape[1]].set(a)

    w_packed = jnp.stack([pad2(w1s), pad2(w2s), pad2(w3t)])       # [3, 128, 128]
    b_packed = (jnp.zeros((8, PAD), jnp.float32)
                .at[0, :HIDDEN].set(b1s[0])
                .at[1, :HIDDEN].set(b2s[0])
                .at[2, :EMBED * ADD_MULTIPLES].set(b3t[0]))       # [8, 128]
    return w_packed, b_packed


# --------------------------- plain-JAX reference -----------------------------
def dummy_enc_reference(x, w1, b1, w2, b2, w3, b3):
    lon = jnp.deg2rad(x[:, 0:1].astype(jnp.float32))
    lat = jnp.deg2rad(x[:, 1:2].astype(jnp.float32))
    theta = jnp.pi / 2.0 - lat
    feats = _sh_features(jnp.cos(theta), jnp.sin(theta), lon)
    pe = jnp.concatenate(feats, axis=1)                           # [B, N_FEAT]
    h = jnp.sin(W0_FIRST * (pe @ w1 + b1))
    h = jnp.sin(W0 * (h @ w2 + b2))
    emb = h @ w3 + b3
    return jnp.concatenate([emb] * ADD_MULTIPLES, axis=1)


if __name__ == "__main__":
    key = jax.random.PRNGKey(0)
    kx, kp = jax.random.split(key)

    # x: [B, 2] = (longitude in [-180, 180], latitude in [-90, 90])
    lon = jax.random.uniform(kx, (B, 1), jnp.float32, -180.0, 180.0)
    lat = jax.random.uniform(jax.random.fold_in(kx, 1), (B, 1), jnp.float32, -90.0, 90.0)
    x = jnp.concatenate([lon, lat], axis=1)

    raw = init_params(kp)
    w_packed, b_packed = pack_params(*raw)

    out = jax.jit(dummy_enc_forward)(x, w_packed, b_packed)
    out = jax.block_until_ready(out)

    assert out.shape == (B, EMBED * ADD_MULTIPLES), out.shape
    assert out.dtype == jnp.float32
    # concat semantics: the ADD_MULTIPLES chunks must be identical copies
    assert bool(jnp.allclose(out[:, :EMBED], out[:, EMBED:2 * EMBED]))
    assert bool(jnp.allclose(out[:, :EMBED], out[:, 2 * EMBED:]))
    # numerics vs plain-JAX reference (same L=4 SH + SIREN forward)
    ref = dummy_enc_reference(x, *raw)
    assert bool(jnp.allclose(out, ref, rtol=1e-3, atol=1e-4)), \
        float(jnp.max(jnp.abs(out - ref)))
    print("KERNEL_OK")
</pallas_src>

<mosaic_0001>
module attributes {stable_mosaic.version = 11 : i64} {
  func.func @dummy_enc_kernel(%arg0: i32, %arg1: memref<8x2xf32, #tpu.memory_space<vmem>>, %arg2: memref<3x128x128xf32, #tpu.memory_space<vmem>>, %arg3: memref<8x128xf32, #tpu.memory_space<vmem>>, %arg4: memref<8x128xf32, #tpu.memory_space<vmem>>) attributes {dimension_semantics = [#tpu.dimension_semantics<parallel>], iteration_bounds = array<i64: 1>, scalar_prefetch = 0 : i64, scratch_operands = 0 : i64, tpu.core_type = #tpu.core_type<tc>, window_params = [{transform_indices = @transform_0, window_bounds = array<i64: 8, 2>}, {pipeline_mode = #tpu.pipeline_mode<synchronous>, transform_indices = @transform_1, window_bounds = array<i64: 3, 128, 128>}, {pipeline_mode = #tpu.pipeline_mode<synchronous>, transform_indices = @transform_2, window_bounds = array<i64: 8, 128>}, {transform_indices = @transform_3, window_bounds = array<i64: 8, 128>}]} {
    %c0 = arith.constant 0 : index
    %c0_0 = arith.constant 0 : index
    %0 = vector.load %arg1[%c0, %c0_0] : memref<8x2xf32, #tpu.memory_space<vmem>>, vector<8x2xf32>
    %1 = vector.extract_strided_slice %0 {offsets = [0, 0], sizes = [8, 1], strides = [1, 1]} : vector<8x2xf32> to vector<8x1xf32>
    %cst = arith.constant 0.0174532924 : f32
    %2 = vector.broadcast %cst : f32 to vector<8x1xf32>
    %3 = arith.mulf %1, %2 : vector<8x1xf32>
    %4 = vector.extract_strided_slice %0 {offsets = [0, 1], sizes = [8, 1], strides = [1, 1]} : vector<8x2xf32> to vector<8x1xf32>
    %cst_1 = arith.constant 0.0174532924 : f32
    %5 = vector.broadcast %cst_1 : f32 to vector<8x1xf32>
    %6 = arith.mulf %4, %5 : vector<8x1xf32>
    %cst_2 = arith.constant 1.57079637 : f32
    %7 = vector.broadcast %cst_2 : f32 to vector<8x1xf32>
    %8 = arith.subf %7, %6 : vector<8x1xf32>
    %9 = math.cos %8 : vector<8x1xf32>
    %10 = math.sin %8 : vector<8x1xf32>
    %cst_3 = arith.constant 1.000000e+00 : f32
    %11 = vector.broadcast %cst_3 : f32 to vector<8x1xf32>
    %cst_4 = arith.constant -1.000000e+00 : f32
    %12 = vector.broadcast %cst_4 : f32 to vector<8x1xf32>
    %13 = arith.mulf %12, %10 : vector<8x1xf32>
    %14 = arith.mulf %10, %10 : vector<8x1xf32>
    %cst_5 = arith.constant 3.000000e+00 : f32
    %15 = vector.broadcast %cst_5 : f32 to vector<8x1xf32>
    %16 = arith.mulf %15, %14 : vector<8x1xf32>
    %17 = arith.mulf %10, %10 : vector<8x1xf32>
    %18 = arith.mulf %10, %17 : vector<8x1xf32>
    %cst_6 = arith.constant -1.500000e+01 : f32
    %19 = vector.broadcast %cst_6 : f32 to vector<8x1xf32>
    %20 = arith.mulf %19, %18 : vector<8x1xf32>
    %cst_7 = arith.constant 1.000000e+00 : f32
    %21 = vector.broadcast %cst_7 : f32 to vector<8x1xf32>
    %22 = arith.mulf %21, %9 : vector<8x1xf32>
    %23 = arith.mulf %22, %11 : vector<8x1xf32>
    %cst_8 = arith.constant 3.000000e+00 : f32
    %24 = vector.broadcast %cst_8 : f32 to vector<8x1xf32>
    %25 = arith.mulf %24, %9 : vector<8x1xf32>
    %26 = arith.mulf %25, %13 : vector<8x1xf32>
    %cst_9 = arith.constant 5.000000e+00 : f32
    %27 = vector.broadcast %cst_9 : f32 to vector<8x1xf32>
    %28 = arith.mulf %27, %9 : vector<8x1xf32>
    %29 = arith.mulf %28, %16 : vector<8x1xf32>
    %cst_10 = arith.constant 3.000000e+00 : f32
    %30 = vector.broadcast %cst_10 : f32 to vector<8x1xf32>
    %31 = arith.mulf %30, %9 : vector<8x1xf32>
    %32 = arith.mulf %31, %23 : vector<8x1xf32>
    %cst_11 = arith.constant 1.000000e+00 : f32
    %33 = vector.broadcast %cst_11 : f32 to vector<8x1xf32>
    %34 = arith.mulf %33, %11 : vector<8x1xf32>
    %35 = arith.subf %32, %34 : vector<8x1xf32>
    %cst_12 = arith.constant 2.000000e+00 : f32
    %36 = vector.broadcast %cst_12 : f32 to vector<8x1xf32>
    %37 = arith.divf %35, %36 : vector<8x1xf32>
    %cst_13 = arith.constant 5.000000e+00 : f32
    %38 = vector.broadcast %cst_13 : f32 to vector<8x1xf32>
    %39 = arith.mulf %38, %9 : vector<8x1xf32>
    %40 = arith.mulf %39, %37 : vector<8x1xf32>
    %cst_14 = arith.constant 2.000000e+00 : f32
    %41 = vector.broadcast %cst_14 : f32 to vector<8x1xf32>
    %42 = arith.mulf %41, %23 : vector<8x1xf32>
    %43 = arith.subf %40, %42 : vector<8x1xf32>
    %cst_15 = arith.constant 3.000000e+00 : f32
    %44 = vector.broadcast %cst_15 : f32 to vector<8x1xf32>
    %45 = arith.divf %43, %44 : vector<8x1xf32>
    %cst_16 = arith.constant 5.000000e+00 : f32
    %46 = vector.broadcast %cst_16 : f32 to vector<8x1xf32>
    %47 = arith.mulf %46, %9 : vector<8x1xf32>
    %48 = arith.mulf %47, %26 : vector<8x1xf32>
    %cst_17 = arith.constant 3.000000e+00 : f32
    %49 = vector.broadcast %cst_17 : f32 to vector<8x1xf32>
    %50 = arith.mulf %49, %13 : vector<8x1xf32>
    %51 = arith.subf %48, %50 : vector<8x1xf32>
    %cst_18 = arith.constant 2.000000e+00 : f32
    %52 = vector.broadcast %cst_18 : f32 to vector<8x1xf32>
    %53 = arith.divf %51, %52 : vector<8x1xf32>
    %cst_19 = arith.constant 0.282094806 : f32
    %54 = vector.broadcast %cst_19 : f32 to vector<8x1xf32>
    %55 = arith.mulf %54, %11 : vector<8x1xf32>
    %cst_20 = arith.constant 0.488602519 : f32
    %56 = vector.broadcast %cst_20 : f32 to vector<8x1xf32>
    %57 = arith.mulf %56, %13 : vector<8x1xf32>
    %cst_21 = arith.constant 1.000000e+00 : f32
    %58 = vector.broadcast %cst_21 : f32 to vector<8x1xf32>
    %59 = arith.mulf %58, %3 : vector<8x1xf32>
    %60 = math.sin %59 : vector<8x1xf32>
    %61 = arith.mulf %57, %60 : vector<8x1xf32>
    %cst_22 = arith.constant 0.488602519 : f32
    %62 = vector.broadcast %cst_22 : f32 to vector<8x1xf32>
    %63 = arith.mulf %62, %23 : vector<8x1xf32>
    %cst_23 = arith.constant 0.488602519 : f32
    %64 = vector.broadcast %cst_23 : f32 to vector<8x1xf32>
    %65 = arith.mulf %64, %13 : vector<8x1xf32>
    %cst_24 = arith.constant 1.000000e+00 : f32
    %66 = vector.broadcast %cst_24 : f32 to vector<8x1xf32>
    %67 = arith.mulf %66, %3 : vector<8x1xf32>
    %68 = math.cos %67 : vector<8x1xf32>
    %69 = arith.mulf %65, %68 : vector<8x1xf32>
    %cst_25 = arith.constant 0.1820914 : f32
    %70 = vector.broadcast %cst_25 : f32 to vector<8x1xf32>
    %71 = arith.mulf %70, %16 : vector<8x1xf32>
    %cst_26 = arith.constant 2.000000e+00 : f32
    %72 = vector.broadcast %cst_26 : f32 to vector<8x1xf32>
    %73 = arith.mulf %72, %3 : vector<8x1xf32>
    %74 = math.sin %73 : vector<8x1xf32>
    %75 = arith.mulf %71, %74 : vector<8x1xf32>
    %cst_27 = arith.constant 0.3641828 : f32
    %76 = vector.broadcast %cst_27 : f32 to vector<8x1xf32>
    %77 = arith.mulf %76, %26 : vector<8x1xf32>
    %cst_28 = arith.constant 1.000000e+00 : f32
    %78 = vector.broadcast %cst_28 : f32 to vector<8x1xf32>
    %79 = arith.mulf %78, %3 : vector<8x1xf32>
    %80 = math.sin %79 : vector<8x1xf32>
    %81 = arith.mulf %77, %80 : vector<8x1xf32>
    %cst_29 = arith.constant 0.63078314 : f32
    %82 = vector.broadcast %cst_29 : f32 to vector<8x1xf32>
    %83 = arith.mulf %82, %37 : vector<8x1xf32>
    %cst_30 = arith.constant 0.3641828 : f32
    %84 = vector.broadcast %cst_30 : f32 to vector<8x1xf32>
    %85 = arith.mulf %84, %26 : vector<8x1xf32>
    %cst_31 = arith.constant 1.000000e+00 : f32
    %86 = vector.broadcast %cst_31 : f32 to vector<8x1xf32>
    %87 = arith.mulf %86, %3 : vector<8x1xf32>
    %88 = math.cos %87 : vector<8x1xf32>
    %89 = arith.mulf %85, %88 : vector<8x1xf32>
    %cst_32 = arith.constant 0.1820914 : f32
    %90 = vector.broadcast %cst_32 : f32 to vector<8x1xf32>
    %91 = arith.mulf %90, %16 : vector<8x1xf32>
    %cst_33 = arith.constant 2.000000e+00 : f32
    %92 = vector.broadcast %cst_33 : f32 to vector<8x1xf32>
    %93 = arith.mulf %92, %3 : vector<8x1xf32>
    %94 = math.cos %93 : vector<8x1xf32>
    %95 = arith.mulf %91, %94 : vector<8x1xf32>
    %cst_34 = arith.constant 0.0393362381 : f32
    %96 = vector.broadcast %cst_34 : f32 to vector<8x1xf32>
    %97 = arith.mulf %96, %20 : vector<8x1xf32>
    %cst_35 = arith.constant 3.000000e+00 : f32
    %98 = vector.broadcast %cst_35 : f32 to vector<8x1xf32>
    %99 = arith.mulf %98, %3 : vector<8x1xf32>
    %100 = math.sin %99 : vector<8x1xf32>
    %101 = arith.mulf %97, %100 : vector<8x1xf32>
    %cst_36 = arith.constant 0.0963537171 : f32
    %102 = vector.broadcast %cst_36 : f32 to vector<8x1xf32>
    %103 = arith.mulf %102, %29 : vector<8x1xf32>
    %cst_37 = arith.constant 2.000000e+00 : f32
    %104 = vector.broadcast %cst_37 : f32 to vector<8x1xf32>
    %105 = arith.mulf %104, %3 : vector<8x1xf32>
    %106 = math.sin %105 : vector<8x1xf32>
    %107 = arith.mulf %103, %106 : vector<8x1xf32>
    %cst_38 = arith.constant 0.304697186 : f32
    %108 = vector.broadcast %cst_38 : f32 to vector<8x1xf32>
    %109 = arith.mulf %108, %53 : vector<8x1xf32>
    %cst_39 = arith.constant 1.000000e+00 : f32
    %110 = vector.broadcast %cst_39 : f32 to vector<8x1xf32>
    %111 = arith.mulf %110, %3 : vector<8x1xf32>
    %112 = math.sin %111 : vector<8x1xf32>
    %113 = arith.mulf %109, %112 : vector<8x1xf32>
    %cst_40 = arith.constant 0.746352672 : f32
    %114 = vector.broadcast %cst_40 : f32 to vector<8x1xf32>
    %115 = arith.mulf %114, %45 : vector<8x1xf32>
    %cst_41 = arith.constant 0.304697186 : f32
    %116 = vector.broadcast %cst_41 : f32 to vector<8x1xf32>
    %117 = arith.mulf %116, %53 : vector<8x1xf32>
    %cst_42 = arith.constant 1.000000e+00 : f32
    %118 = vector.broadcast %cst_42 : f32 to vector<8x1xf32>
    %119 = arith.mulf %118, %3 : vector<8x1xf32>
    %120 = math.cos %119 : vector<8x1xf32>
    %121 = arith.mulf %117, %120 : vector<8x1xf32>
    %cst_43 = arith.constant 0.0963537171 : f32
    %122 = vector.broadcast %cst_43 : f32 to vector<8x1xf32>
    %123 = arith.mulf %122, %29 : vector<8x1xf32>
    %cst_44 = arith.constant 2.000000e+00 : f32
    %124 = vector.broadcast %cst_44 : f32 to vector<8x1xf32>
    %125 = arith.mulf %124, %3 : vector<8x1xf32>
    %126 = math.cos %125 : vector<8x1xf32>
    %127 = arith.mulf %123, %126 : vector<8x1xf32>
    %cst_45 = arith.constant 0.0393362381 : f32
    %128 = vector.broadcast %cst_45 : f32 to vector<8x1xf32>
    %129 = arith.mulf %128, %20 : vector<8x1xf32>
    %cst_46 = arith.constant 3.000000e+00 : f32
    %130 = vector.broadcast %cst_46 : f32 to vector<8x1xf32>
    %131 = arith.mulf %130, %3 : vector<8x1xf32>
    %132 = math.cos %131 : vector<8x1xf32>
    %133 = arith.mulf %129, %132 : vector<8x1xf32>
    %c0_47 = arith.constant 0 : index
    %c0_48 = arith.constant 0 : index
    %c0_49 = arith.constant 0 : index
    %134 = vector.load %arg2[%c0_47, %c0_48, %c0_49] : memref<3x128x128xf32, #tpu.memory_space<vmem>>, vector<1x128x128xf32>
    %135 = vector.shape_cast %134 : vector<1x128x128xf32> to vector<128x128xf32>
    %136 = vector.extract_strided_slice %135 {offsets = [0, 0], sizes = [1, 128], strides = [1, 1]} : vector<128x128xf32> to vector<1x128xf32>
    %137 = vector.broadcast %55 : vector<8x1xf32> to vector<8x128xf32>
    %138 = vector.broadcast %136 : vector<1x128xf32> to vector<8x128xf32>
    %139 = arith.mulf %137, %138 : vector<8x128xf32>
    %140 = vector.extract_strided_slice %135 {offsets = [1, 0], sizes = [1, 128], strides = [1, 1]} : vector<128x128xf32> to vector<1x128xf32>
    %141 = vector.broadcast %61 : vector<8x1xf32> to vector<8x128xf32>
    %142 = vector.broadcast %140 : vector<1x128xf32> to vector<8x128xf32>
    %143 = arith.mulf %141, %142 : vector<8x128xf32>
    %144 = arith.addf %139, %143 : vector<8x128xf32>
    %145 = vector.extract_strided_slice %135 {offsets = [2, 0], sizes = [1, 128], strides = [1, 1]} : vector<128x128xf32> to vector<1x128xf32>
    %146 = vector.broadcast %63 : vector<8x1xf32> to vector<8x128xf32>
    %147 = vector.broadcast %145 : vector<1x128xf32> to vector<8x128xf32>
    %148 = arith.mulf %146, %147 : vector<8x128xf32>
    %149 = arith.addf %144, %148 : vector<8x128xf32>
    %150 = vector.extract_strided_slice %135 {offsets = [3, 0], sizes = [1, 128], strides = [1, 1]} : vector<128x128xf32> to vector<1x128xf32>
    %151 = vector.broadcast %69 : vector<8x1xf32> to vector<8x128xf32>
    %152 = vector.broadcast %150 : vector<1x128xf32> to vector<8x128xf32>
    %153 = arith.mulf %151, %152 : vector<8x128xf32>
    %154 = arith.addf %149, %153 : vector<8x128xf32>
    %155 = vector.extract_strided_slice %135 {offsets = [4, 0], sizes = [1, 128], strides = [1, 1]} : vector<128x128xf32> to vector<1x128xf32>
    %156 = vector.broadcast %75 : vector<8x1xf32> to vector<8x128xf32>
    %157 = vector.broadcast %155 : vector<1x128xf32> to vector<8x128xf32>
    %158 = arith.mulf %156, %157 : vector<8x128xf32>
    %159 = arith.addf %154, %158 : vector<8x128xf32>
    %160 = vector.extract_strided_slice %135 {offsets = [5, 0], sizes = [1, 128], strides = [1, 1]} : vector<128x128xf32> to vector<1x128xf32>
    %161 = vector.broadcast %81 : vector<8x1xf32> to vector<8x128xf32>
    %162 = vector.broadcast %160 : vector<1x128xf32> to vector<8x128xf32>
    %163 = arith.mulf %161, %162 : vector<8x128xf32>
    %164 = arith.addf %159, %163 : vector<8x128xf32>
    %165 = vector.extract_strided_slice %135 {offsets = [6, 0], sizes = [1, 128], strides = [1, 1]} : vector<128x128xf32> to vector<1x128xf32>
    %166 = vector.broadcast %83 : vector<8x1xf32> to vector<8x128xf32>
    %167 = vector.broadcast %165 : vector<1x128xf32> to vector<8x128xf32>
    %168 = arith.mulf %166, %167 : vector<8x128xf32>
    %169 = arith.addf %164, %168 : vector<8x128xf32>
    %170 = vector.extract_strided_slice %135 {offsets = [7, 0], sizes = [1, 128], strides = [1, 1]} : vector<128x128xf32> to vector<1x128xf32>
    %171 = vector.broadcast %89 : vector<8x1xf32> to vector<8x128xf32>
    %172 = vector.broadcast %170 : vector<1x128xf32> to vector<8x128xf32>
    %173 = arith.mulf %171, %172 : vector<8x128xf32>
    %174 = arith.addf %169, %173 : vector<8x128xf32>
    %175 = vector.extract_strided_slice %135 {offsets = [8, 0], sizes = [1, 128], strides = [1, 1]} : vector<128x128xf32> to vector<1x128xf32>
    %176 = vector.broadcast %95 : vector<8x1xf32> to vector<8x128xf32>
    %177 = vector.broadcast %175 : vector<1x128xf32> to vector<8x128xf32>
    %178 = arith.mulf %176, %177 : vector<8x128xf32>
    %179 = arith.addf %174, %178 : vector<8x128xf32>
    %180 = vector.extract_strided_slice %135 {offsets = [9, 0], sizes = [1, 128], strides = [1, 1]} : vector<128x128xf32> to vector<1x128xf32>
    %181 = vector.broadcast %101 : vector<8x1xf32> to vector<8x128xf32>
    %182 = vector.broadcast %180 : vector<1x128xf32> to vector<8x128xf32>
    %183 = arith.mulf %181, %182 : vector<8x128xf32>
    %184 = arith.addf %179, %183 : vector<8x128xf32>
    %185 = vector.extract_strided_slice %135 {offsets = [10, 0], sizes = [1, 128], strides = [1, 1]} : vector<128x128xf32> to vector<1x128xf32>
    %186 = vector.broadcast %107 : vector<8x1xf32> to vector<8x128xf32>
    %187 = vector.broadcast %185 : vector<1x128xf32> to vector<8x128xf32>
    %188 = arith.mulf %186, %187 : vector<8x128xf32>
    %189 = arith.addf %184, %188 : vector<8x128xf32>
    %190 = vector.extract_strided_slice %135 {offsets = [11, 0], sizes = [1, 128], strides = [1, 1]} : vector<128x128xf32> to vector<1x128xf32>
    %191 = vector.broadcast %113 : vector<8x1xf32> to vector<8x128xf32>
    %192 = vector.broadcast %190 : vector<1x128xf32> to vector<8x128xf32>
    %193 = arith.mulf %191, %192 : vector<8x128xf32>
    %194 = arith.addf %189, %193 : vector<8x128xf32>
    %195 = vector.extract_strided_slice %135 {offsets = [12, 0], sizes = [1, 128], strides = [1, 1]} : vector<128x128xf32> to vector<1x128xf32>
    %196 = vector.broadcast %115 : vector<8x1xf32> to vector<8x128xf32>
    %197 = vector.broadcast %195 : vector<1x128xf32> to vector<8x128xf32>
    %198 = arith.mulf %196, %197 : vector<8x128xf32>
    %199 = arith.addf %194, %198 : vector<8x128xf32>
    %200 = vector.extract_strided_slice %135 {offsets = [13, 0], sizes = [1, 128], strides = [1, 1]} : vector<128x128xf32> to vector<1x128xf32>
    %201 = vector.broadcast %121 : vector<8x1xf32> to vector<8x128xf32>
    %202 = vector.broadcast %200 : vector<1x128xf32> to vector<8x128xf32>
    %203 = arith.mulf %201, %202 : vector<8x128xf32>
    %204 = arith.addf %199, %203 : vector<8x128xf32>
    %205 = vector.extract_strided_slice %135 {offsets = [14, 0], sizes = [1, 128], strides = [1, 1]} : vector<128x128xf32> to vector<1x128xf32>
    %206 = vector.broadcast %127 : vector<8x1xf32> to vector<8x128xf32>
    %207 = vector.broadcast %205 : vector<1x128xf32> to vector<8x128xf32>
    %208 = arith.mulf %206, %207 : vector<8x128xf32>
    %209 = arith.addf %204, %208 : vector<8x128xf32>
    %210 = vector.extract_strided_slice %135 {offsets = [15, 0], sizes = [1, 128], strides = [1, 1]} : vector<128x128xf32> to vector<1x128xf32>
    %211 = vector.broadcast %133 : vector<8x1xf32> to vector<8x128xf32>
    %212 = vector.broadcast %210 : vector<1x128xf32> to vector<8x128xf32>
    %213 = arith.mulf %211, %212 : vector<8x128xf32>
    %214 = arith.addf %209, %213 : vector<8x128xf32>
    %c0_50 = arith.constant 0 : index
    %c0_51 = arith.constant 0 : index
    %215 = vector.load %arg3[%c0_50, %c0_51] : memref<8x128xf32, #tpu.memory_space<vmem>>, vector<1x128xf32>
    %216 = vector.broadcast %215 : vector<1x128xf32> to vector<8x128xf32>
    %217 = arith.addf %214, %216 : vector<8x128xf32>
    %218 = math.sin %217 : vector<8x128xf32>
    %c1 = arith.constant 1 : index
    %c0_52 = arith.constant 0 : index
    %c0_53 = arith.constant 0 : index
    %219 = vector.load %arg2[%c1, %c0_52, %c0_53] : memref<3x128x128xf32, #tpu.memory_space<vmem>>, vector<1x128x128xf32>
    %220 = vector.shape_cast %219 : vector<1x128x128xf32> to vector<128x128xf32>
    %cst_54 = arith.constant dense<0.000000e+00> : vector<8x128xf32>
    %221 = tpu.matmul %218, %220, %cst_54 {dimension_numbers = #tpu.dot_dimension_numbers<[1], [0], [0], [1], [0, 0, 1, 1], [], []>} : vector<8x128xf32>, vector<128x128xf32>, vector<8x128xf32> -> vector<8x128xf32>
    %c1_55 = arith.constant 1 : index
    %c0_56 = arith.constant 0 : index
    %222 = vector.load %arg3[%c1_55, %c0_56] : memref<8x128xf32, #tpu.memory_space<vmem>>, vector<1x128xf32>
    %223 = vector.broadcast %222 : vector<1x128xf32> to vector<8x128xf32>
    %224 = arith.addf %221, %223 : vector<8x128xf32>
    %225 = math.sin %224 : vector<8x128xf32>
    %c2 = arith.constant 2 : index
    %c0_57 = arith.constant 0 : index
    %c0_58 = arith.constant 0 : index
    %226 = vector.load %arg2[%c2, %c0_57, %c0_58] : memref<3x128x128xf32, #tpu.memory_space<vmem>>, vector<1x128x128xf32>
    %227 = vector.shape_cast %226 : vector<1x128x128xf32> to vector<128x128xf32>
    %cst_59 = arith.constant dense<0.000000e+00> : vector<8x128xf32>
    %228 = tpu.matmul %225, %227, %cst_59 {dimension_numbers = #tpu.dot_dimension_numbers<[1], [0], [0], [1], [0, 0, 1, 1], [], []>} : vector<8x128xf32>, vector<128x128xf32>, vector<8x128xf32> -> vector<8x128xf32>
    %c2_60 = arith.constant 2 : index
    %c0_61 = arith.constant 0 : index
    %229 = vector.load %arg3[%c2_60, %c0_61] : memref<8x128xf32, #tpu.memory_space<vmem>>, vector<1x128xf32>
    %230 = vector.broadcast %229 : vector<1x128xf32> to vector<8x128xf32>
    %231 = arith.addf %228, %230 : vector<8x128xf32>
    %c0_62 = arith.constant 0 : index
    %c0_63 = arith.constant 0 : index
    %232 = vector.load %arg4[%c0_62, %c0_63] : memref<8x128xf32, #tpu.memory_space<vmem>>, vector<8x128xf32>
    tpu.vector_store %arg4[%c0_62, %c0_63], %231 {strides = array<i32>} : memref<8x128xf32, #tpu.memory_space<vmem>>, vector<8x128xf32>,
    return
  }
  func.func @transform_0(%arg0: i32) -> (i32, i32) {
    %c0_i32 = arith.constant 0 : i32
    %c0_i32_0 = arith.constant 0 : i32
    return %arg0, %c0_i32 : i32, i32
  }
  func.func @transform_1(%arg0: i32) -> (i32, i32, i32) {
    %c0_i32 = arith.constant 0 : i32
    %c0_i32_0 = arith.constant 0 : i32
    %c0_i32_1 = arith.constant 0 : i32
    %c0_i32_2 = arith.constant 0 : i32
    return %c0_i32, %c0_i32_0, %c0_i32_1 : i32, i32, i32
  }
  func.func @transform_2(%arg0: i32) -> (i32, i32) {
    %c0_i32 = arith.constant 0 : i32
    %c0_i32_0 = arith.constant 0 : i32
    %c0_i32_1 = arith.constant 0 : i32
    return %c0_i32, %c0_i32_0 : i32, i32
  }
  func.func @transform_3(%arg0: i32) -> (i32, i32) {
    %c0_i32 = arith.constant 0 : i32
    %c0_i32_0 = arith.constant 0 : i32
    return %arg0, %c0_i32 : i32, i32
  }
}

</mosaic_0001>

<bundles_post_ra>
// kernel: dummy_enc_forward.1
= control target key start
LH: loop header
LB: loop body
LE: loop exit
PB: predicated region body
PF: predicated region fallthrough
CT: control target
= control target key end

     0   :  { %8 = vsyncpa [#allocation3], 0  ;;  %s2236_s0 = inlined_call_operand.vmem [shape: f32[8,2], index: 0, kind: input, shape index: {}]   ;;  %s2237_s1 = inlined_call_operand.hbm [shape: f32[3,128,128], index: 1, kind: input, shape index: {}]   ;;  %s2238_s2 = inlined_call_operand.vmem [shape: f32[8,128], index: 2, kind: input, shape index: {}]   ;;  %s2239_s3 = inlined_call_operand.hbm [shape: f32[8,128], index: 3, kind: output, shape index: {}]  }
   0x1   :  { %9 = vsyncpa [#allocation4], 0  ;;  %s1771_s12 = smov [#allocation2]  }
   0x2   :  { %s17_s13 = sshll.u32 %s1771_s12, 4  ;;  %s18_s13 = int_to_ptr.vmem [resolvable:$true] %s17_s13 }
   0x3   :  { %s1735_s14 = scalar_lea.vmem %s18_s13, 6144  ;;  %p1740_p1 = scmp.lt.s32.totalorder %s18_s13, %s18_s13 }
   0x4   :  { %p1736_p0 = scmp.ne.s32.totalorder %s18_s13, %s1735_s14  ;;  %p1741_p2 = scmp.lt.s32.totalorder %s1735_s14, %s1735_s14 }
   0x6   :  { %p1742_p3 = por %p1741_p2, %p1740_p1 }
   0x8   :  { %p1743_p4 = pnand %p1742_p3, %p1736_p0 }
   0xa   :  { %1746 = shalt.err (!%p1743_p4)
}
   0xb   :  { %s1772_s15 = smov 128   ;;  %s1773_s16 = smov 8  }
   0xc   :  { %23 = dma.hbm_to_vmem [thread:$0]  %s2237_s1, 6144, %s18_s13, [#allocation3], %s1772_s15, %s1772_s15, %s1773_s16  }
   0xd   :  { %1767 = dma.done.wait [#allocation3], 6144  }
   0xe   :  { %1768 = vsyncadd [#allocation3], 4294961152  ;;  %v29_v0 = vld [vmem:[%s2236_s0] sm:$0xff]  ;;  %v1774_v27 = vmov 683565275   ;;  %s1780_s0 = smov 1  }
   0xf   :  { %v1811_v1 = vmul.f32 0.017453292, %v29_v0  ;;  %v1775_v29 = vmov 2475754826   ;;  %v1776_v31 = vmov 2131351028  }
  0x10   :  { %v1777_v33 = vmov 2102212464   ;;  %v1778_v35 = vmov 920167782   ;;  %v1779_v42 = vmov 1326507024  }
  0x11   :  { %v262_v2 = vand.u32 2147483647, %v1811_v1  ;;  %v265_v3 = vand.u32 2139095040, %v1811_v1  ;;  %v1816_v4 = vmul.f32 2.0, %v1811_v1  ;;  %v1819_v5 = vmul.f32 3.0, %v1811_v1  ;;  %s1784_s26 = smov [#allocation5]  }
  0x12   :  { %vm264_vm13 = vcmp.lt.s32.totalorder %v1811_v1, 0  ;;  %s1506_s27 = sshll.u32 %s1784_s26, 4  ;;  %s1507_s27 = int_to_ptr.vmem [resolvable:$true] %s1506_s27 }
  0x13   :  { %v266_v6 = vshrl.u32 %v265_v3, 23  ;;  %v269_v7 = vand.u32 8388607, %v262_v2  ;;  %v482_v8 = vand.u32 2147483647, %v1816_v4  ;;  %v485_v9 = vand.u32 2139095040, %v1816_v4  ;;  %p1752_p6 = scmp.lt.s32.totalorder %s1507_s27, %s1507_s27 }
  0x14   :  { %v708_v13 = vand.u32 2139095040, %v1819_v5  ;;  %vm1930_vm15 = vcmp.le.f32.partialorder %v262_v2, 0.7853982  ;;  %s1747_s28 = scalar_lea.vmem %s1507_s27, 128 }
  0x15   :  { %v1524_v10 = vadd.s32 4294967169, %v266_v6  ;;  %v486_v11 = vshrl.u32 %v485_v9, 23  ;;  %v489_v12 = vand.u32 8388607, %v482_v8  ;;  %v270_v15 = vor.u32 8388608, %v269_v7  ;;  %p1748_p5 = scmp.ne.s32.totalorder %s1507_s27, %s1747_s28  ;;  %p1753_p7 = scmp.lt.s32.totalorder %s1747_s28, %s1747_s28 }
  0x16   :  { %v709_v18 = vshrl.u32 %v708_v13, 23 }
  0x17   :  { %v272_v14 = vadd.s32 1, %v1524_v10  ;;  %v1532_v16 = vadd.s32 4294967169, %v486_v11  ;;  %v490_v17 = vor.u32 8388608, %v489_v12  ;;  %v1828_v23 = vshll.u32 %v270_v15, 8  ;;  %p1754_p8 = por %p1753_p7, %p1752_p6 }
  0x18   :  { %v1832_v25 = vadd.s32 4294967169, %v709_v18 }
  0x19   :  { %vm273_vm0 = vcmp.gt.s32.totalorder %v272_v14, 0  ;;  %v492_v20 = vadd.s32 1, %v1532_v16  ;;  %v1830_v24 = vshll.u32 %v490_v17, 8  ;;  %p1755_p9 = pnand %p1754_p8, %p1748_p5 }
  0x1a   :  { %v274_v19 = vsel %vm273_vm0, %v272_v14, 0 }
  0x1b   :  { %v275_v21 = vshrl.u32 %v274_v19, 5  ;;  %v276_v22 = vand.u32 31, %v274_v19  ;;  %vm493_vm1 = vcmp.gt.s32.totalorder %v492_v20, 0 }
  0x1c   :  { %v494_v47 = vsel %vm493_vm1, %v492_v20, 0 }
  0x1d   :  { %v277_v26 = vsub.s32 32, %v276_v22  ;;  %v279_v28 = vshll.u32 %v1774_v27, %v276_v22  ;;  %v282_v30 = vshll.u32 %v1775_v29, %v276_v22  ;;  %v285_v32 = vshll.u32 %v1776_v31, %v276_v22 }
  0x1e   :  { %v288_v34 = vshll.u32 %v1777_v33, %v276_v22  ;;  %v291_v36 = vshll.u32 %v1778_v35, %v276_v22  ;;  %vm294_vm2 = vcmp.lt.s32.totalorder %v275_v21, 1  ;;  %vm295_vm3 = vcmp.lt.s32.totalorder %v275_v21, 2 }
  0x1f   :  { %v278_v37 = vshrl.u32 %v1774_v27, %v277_v26  ;;  %v280_v38 = vshrl.u32 %v1775_v29, %v277_v26  ;;  %v283_v39 = vshrl.u32 %v1776_v31, %v277_v26  ;;  %v286_v40 = vshrl.u32 %v1777_v33, %v277_v26 }
  0x20   :  { %v289_v41 = vshrl.u32 %v1778_v35, %v277_v26  ;;  %v292_v43 = vshrl.u32 %v1779_v42, %v277_v26  ;;  %vm296_vm4 = vcmp.lt.s32.totalorder %v275_v21, 3  ;;  %vm297_vm5 = vcmp.lt.s32.totalorder %v275_v21, 4 }
  0x21   :  { %v281_v44 = vor.u32 %v280_v38, %v279_v28  ;;  %v284_v45 = vor.u32 %v283_v39, %v282_v30  ;;  %v287_v46 = vor.u32 %v286_v40, %v285_v32  ;;  %v495_v50 = vshrl.u32 %v494_v47, 5 }
  0x22   :  { %v290_v48 = vor.u32 %v289_v41, %v288_v34  ;;  %v293_v49 = vor.u32 %v292_v43, %v291_v36  ;;  %v496_v51 = vand.u32 31, %v494_v47  ;;  %v715_v30 = vadd.s32 1, %v1832_v25 }
  0x23   :  { %v298_v52 = vsel %vm294_vm2, %v278_v37, %v281_v44  ;;  %v299_v53 = vsel %vm297_vm5, %v287_v46, 2102212464  ;;  %v302_v54 = vsel %vm294_vm2, %v281_v44, %v284_v45  ;;  %v306_v55 = vsel %vm294_vm2, %v284_v45, %v287_v46 }
  0x24   :  { %v300_v56 = vsel %vm296_vm4, %v284_v45, %v299_v53  ;;  %v303_v57 = vsel %vm297_vm5, %v290_v48, 920167782  ;;  %v307_v58 = vsel %vm297_vm5, %v293_v49, 1326507024  ;;  %v497_v59 = vsub.s32 32, %v496_v51 }
  0x25   :  { %v301_v60 = vsel %vm295_vm3, %v298_v52, %v300_v56  ;;  %v304_v61 = vsel %vm296_vm4, %v287_v46, %v303_v57  ;;  %v308_v62 = vsel %vm296_vm4, %v290_v48, %v307_v58  ;;  %v499_v63 = vshll.u32 %v1774_v27, %v496_v51 }
  0x26   :  { %v305_v0 = vsel %vm295_vm3, %v302_v54, %v304_v61  ;;  %v309_v3 = vsel %vm295_vm3, %v306_v55, %v308_v62  ;;  %v317_v6 = vmul.u32 %v1828_v23, %v301_v60  ;;  %v498_v7 = vshrl.u32 %v1774_v27, %v497_v59 }
  0x27   :  { %v1859_v9 = vmul.u32.u64.low %v1828_v23, %v309_v3  ;;  %v1860_v10 = vmul.u32.u64.high %v1828_v23, %v309_v3, %v1859_v9  ;;  %v1863_v11 = vmul.u32.u64.low %v1828_v23, %v305_v0  ;;  %v1864_v12 = vmul.u32.u64.high %v1828_v23, %v305_v0, %v1863_v11 }
  0x28   :  { %v500_v13 = vshrl.u32 %v1775_v29, %v497_v59  ;;  %v502_v14 = vshll.u32 %v1775_v29, %v496_v51  ;;  %v503_v15 = vshrl.u32 %v1776_v31, %v497_v59  ;;  %v505_v16 = vshll.u32 %v1776_v31, %v496_v51 }
  0x29   :  { %v506_v17 = vshrl.u32 %v1777_v33, %v497_v59  ;;  %v508_v18 = vshll.u32 %v1777_v33, %v496_v51  ;;  %v509_v19 = vshrl.u32 %v1778_v35, %v497_v59  ;;  %v511_v20 = vshll.u32 %v1778_v35, %v496_v51 }
  0x2a   :  { %v501_v21 = vor.u32 %v500_v13, %v499_v63  ;;  %v504_v22 = vor.u32 %v503_v15, %v502_v14  ;;  %v512_v23 = vshrl.u32 %v1779_v42, %v497_v59  ;;  %vm514_vm6 = vcmp.lt.s32.totalorder %v495_v50, 1 }
  0x2b   :  { %vm319_vm7 = vc.u32 %v1860_v10, %v1863_v11  ;;  %v320_v26 = vadd.s32 1, %v1864_v12  ;;  %v507_v28 = vor.u32 %v506_v17, %v505_v16  ;;  %v510_v32 = vor.u32 %v509_v19, %v508_v18 }
  0x2c   :  { %v513_v34 = vor.u32 %v512_v23, %v511_v20  ;;  %vm515_vm8 = vcmp.lt.s32.totalorder %v495_v50, 2  ;;  %vm516_vm9 = vcmp.lt.s32.totalorder %v495_v50, 3  ;;  %vm517_vm10 = vcmp.lt.s32.totalorder %v495_v50, 4 }
  0x2d   :  { %v321_v36 = vsel %vm319_vm7, %v320_v26, %v1864_v12  ;;  %v518_v37 = vsel %vm514_vm6, %v498_v7, %v501_v21  ;;  %v522_v38 = vsel %vm514_vm6, %v501_v21, %v504_v22  ;;  %v519_v40 = vsel %vm517_vm10, %v507_v28, 2102212464 }
  0x2e   :  { %v322_v39 = vadd.s32 %v321_v36, %v317_v6  ;;  %v523_v41 = vsel %vm517_vm10, %v510_v32, 920167782  ;;  %v526_v43 = vsel %vm514_vm6, %v504_v22, %v507_v28  ;;  %v520_v44 = vsel %vm516_vm9, %v504_v22, %v519_v40 }
  0x2f   :  { %v524_v45 = vsel %vm516_vm9, %v507_v28, %v523_v41  ;;  %v527_v46 = vsel %vm517_vm10, %v513_v34, 1326507024  ;;  %vm716_vm11 = vcmp.gt.s32.totalorder %v715_v30, 0  ;;  %v705_v49 = vand.u32 2147483647, %v1819_v5 }
  0x30   :  { %v323_v25 = vadd.s32 536870912, %v322_v39  ;;  %v525_v47 = vsel %vm515_vm8, %v522_v38, %v524_v45  ;;  %v528_v48 = vsel %vm516_vm9, %v510_v32, %v527_v46  ;;  %v521_v51 = vsel %vm515_vm8, %v518_v37, %v520_v44 }
  0x31   :  { %v529_v52 = vsel %vm515_vm8, %v526_v43, %v528_v48  ;;  %v1889_v53 = vmul.u32.u64.low %v1830_v24, %v525_v47  ;;  %v1890_v54 = vmul.u32.u64.high %v1830_v24, %v525_v47, %v1889_v53  ;;  %v717_v58 = vsel %vm716_vm11, %v715_v30, 0 }
  0x32   :  { %v324_v55 = vshrl.u32 %v323_v25, 30  ;;  %v1894_v56 = vmul.u32.u64.low %v1830_v24, %v529_v52  ;;  %v1895_v57 = vmul.u32.u64.high %v1830_v24, %v529_v52, %v1894_v56  ;;  %v719_v59 = vand.u32 31, %v717_v58 }
  0x33   :  { %v1898_v60 = vsub.f32 1.5707964, %v1811_v1  ;;  %v537_v62 = vmul.u32 %v1830_v24, %v521_v51  ;;  %v540_v50 = vadd.s32 1, %v1890_v54  ;;  %v712_v63 = vand.u32 8388607, %v705_v49 }
  0x34   :  { %v325_v61 = vshll.u32 %v324_v55, 30  ;;  %vm539_vm12 = vc.u32 %v1895_v57, %v1889_v53  ;;  %v720_v6 = vsub.s32 32, %v719_v59  ;;  %v722_v24 = vshll.u32 %v1774_v27, %v719_v59 }
  0x35   :  { %v541_v3 = vsel %vm539_vm12, %v540_v50, %v1890_v54  ;;  %v35_v7 = vand.u32 2139095040, %v1898_v60  ;;  %v713_v13 = vor.u32 8388608, %v712_v63  ;;  %v725_v17 = vshll.u32 %v1775_v29, %v719_v59 }
  0x36   :  { %v326_v0 = vsub.s32 %v322_v39, %v325_v61  ;;  %v542_v12 = vadd.s32 %v541_v3, %v537_v62  ;;  %v723_v16 = vshrl.u32 %v1775_v29, %v720_v6  ;;  %v726_v20 = vshrl.u32 %v1776_v31, %v720_v6 }
  0x37   :  { %v36_v18 = vshrl.u32 %v35_v7, 23  ;;  %v728_v21 = vshll.u32 %v1776_v31, %v719_v59  ;;  %v729_v22 = vshrl.u32 %v1777_v33, %v720_v6  ;;  %v1917_v26 = vshll.u32 %v713_v13, 8 }
  0x38   :  { %v328_v9 = vsub.s32 0, %v326_v0  ;;  %v543_v15 = vadd.s32 536870912, %v542_v12  ;;  %v318_v28 = vadd.s32 %v1863_v11, %v1860_v10  ;;  %v731_v32 = vshll.u32 %v1777_v33, %v719_v59 }
  0x39   :  { %v732_v34 = vshrl.u32 %v1778_v35, %v720_v6  ;;  %v348_v36 = vsub.s32 4, %v324_v55  ;;  %v718_v38 = vshrl.u32 %v717_v58, 5  ;;  %v1515_v39 = vadd.s32 4294967169, %v36_v18 }
  0x3a   :  { %v1525_v14 = vmin.u32 %v328_v9, %v326_v0  ;;  %v1915_v23 = vshrl.u32 %v543_v15, 30  ;;  %v724_v40 = vor.u32 %v723_v16, %v722_v24  ;;  %v727_v41 = vor.u32 %v726_v20, %v725_v17 }
  0x3b   :  { %v730_v43 = vor.u32 %v729_v22, %v728_v21  ;;  %v734_v46 = vshll.u32 %v1778_v35, %v719_v59  ;;  %v735_v10 = vshrl.u32 %v1779_v42, %v720_v6  ;;  %v733_v51 = vor.u32 %v732_v34, %v731_v32 }
  0x3c   :  { %v330_v19 = vclz %v1525_v14  ;;  %v545_v37 = vshll.u32 %v1915_v23, 30  ;;  %v721_v54 = vshrl.u32 %v1774_v27, %v720_v6  ;;  %vm737_vm0 = vcmp.lt.s32.totalorder %v718_v38, 1 }
  0x3d   :  { %vm740_vm1 = vcmp.lt.s32.totalorder %v718_v38, 4  ;;  %v349_v59 = vsel %vm264_vm13, %v348_v36, %v324_v55  ;;  %vm484_vm2 = vcmp.lt.s32.totalorder %v1816_v4, 0  ;;  %v736_v62 = vor.u32 %v735_v10, %v734_v46 }
  0x3e   :  { %v1526_v30 = vadd.s32 4294967294, %v330_v19  ;;  %v1924_v45 = vsub.s32 %v542_v12, %v545_v37  ;;  %v742_v2 = vsel %vm740_vm1, %v730_v43, 2102212464  ;;  %vm738_vm3 = vcmp.lt.s32.totalorder %v718_v38, 2 }
  0x3f   :  { %vm739_vm4 = vcmp.lt.s32.totalorder %v718_v38, 3  ;;  %v746_v3 = vsel %vm740_vm1, %v733_v51, 920167782  ;;  %vm1945_vm5 = vcmp.le.f32.partialorder %v482_v8, 0.7853982  ;;  %v538_v55 = vadd.s32 %v1889_v53, %v1895_v57 }
  0x40   :  { %vm1527_vm14 = vcmp.lt.s32.totalorder %v1526_v30, 0  ;;  %v548_v52 = vsub.s32 0, %v1924_v45  ;;  %v741_v9 = vsel %vm737_vm0, %v721_v54, %v724_v40  ;;  %v743_v12 = vsel %vm739_vm4, %v727_v41, %v742_v2 }
  0x41   :  { %v333_v44 = vsel %vm1527_vm14, 0, %v1526_v30  ;;  %v747_v15 = vsel %vm739_vm4, %v730_v43, %v746_v3  ;;  %v749_v24 = vsel %vm737_vm0, %v727_v41, %v730_v43  ;;  %v568_v8 = vsub.s32 4, %v1915_v23 }
  0x42   :  { %v334_v25 = vsub.s32 32, %v333_v44  ;;  %v335_v47 = vshll.u32 %v326_v0, %v333_v44  ;;  %v338_v48 = vsub.s32 4294967266, %v333_v44  ;;  %v1533_v61 = vmin.u32 %v548_v52, %v1924_v45 }
  0x43   :  { %v745_v0 = vsel %vm737_vm0, %v724_v40, %v727_v41  ;;  %v750_v18 = vsel %vm740_vm1, %v736_v62, 1326507024  ;;  %v351_v21 = vsel %vm1930_vm15, 0, %v349_v59  ;;  %v744_v22 = vsel %vm738_vm3, %v741_v9, %v743_v12 }
  0x44   :  { %v336_v56 = vshrl.u32 %v318_v28, %v334_v25  ;;  %v339_v58 = vadd.s32 127, %v338_v48  ;;  %v550_v7 = vclz %v1533_v61  ;;  %v748_v17 = vsel %vm738_vm3, %v745_v0, %v747_v15 }
  0x45   :  { %v751_v53 = vsel %vm739_vm4, %v733_v51, %v750_v18  ;;  %v1960_v57 = vmul.u32.u64.low %v1917_v26, %v748_v17  ;;  %v1961_v20 = vmul.u32.u64.high %v1917_v26, %v748_v17, %v1960_v57  ;;  %v569_v43 = vsel %vm484_vm2, %v568_v8, %v1915_v23 }
  0x46   :  { %v337_v50 = vor.u32 %v336_v56, %v335_v47  ;;  %v340_v63 = vshll.u32 %v339_v58, 23  ;;  %v1534_v16 = vadd.s32 4294967294, %v550_v7  ;;  %v752_v28 = vsel %vm738_vm3, %v749_v24, %v751_v53 }
  0x47   :  { %v1969_v34 = vmul.u32.u64.low %v1917_v26, %v752_v28  ;;  %v1970_v36 = vmul.u32.u64.high %v1917_v26, %v752_v28, %v1969_v34  ;;  %v760_v46 = vmul.u32 %v1917_v26, %v744_v22  ;;  %v763_v38 = vadd.s32 1, %v1961_v20 }
  0x48   :  { %v341_v13 = vor.u32 4788187, %v340_v63  ;;  %v344_v14 = vcvt.s32.f32 %v337_v50  ;;  %vm1535_vm6 = vcmp.lt.s32.totalorder %v1534_v16, 0  ;;  %v42_v10 = vadd.s32 1, %v1515_v39 }
  0x49   :  { %v553_v32 = vsel %vm1535_vm6, 0, %v1534_v16  ;;  %v355_v25 = vadd.s32 3, %v351_v21  ;;  %v32_v51 = vand.u32 2147483647, %v1898_v60  ;;  %vm762_vm7 = vc.u32 %v1970_v36, %v1960_v57 }
  0x4a   :  { %v342_v19 = vand.u32 2147483647, %v341_v13  ;;  %v554_v37 = vsub.s32 32, %v553_v32  ;;  %v555_v40 = vshll.u32 %v1924_v45, %v553_v32  ;;  %v558_v41 = vsub.s32 4294967266, %v553_v32 }
  0x4b   :  { %v571_v45 = vsel %vm1945_vm5, 0, %v569_v43  ;;  %vm43_vm8 = vcmp.gt.s32.totalorder %v42_v10, 0  ;;  %v764_v54 = vsel %vm762_vm7, %v763_v38, %v1961_v20  ;;  %v1989_v56 = vand.u32 3, %v351_v21 }
  0x4c   :  { %v345_v30 = vmul.f32 %v344_v14, %v342_v19  ;;  %v556_v47 = vshrl.u32 %v538_v55, %v554_v37  ;;  %v559_v48 = vadd.s32 127, %v558_v41  ;;  %v765_v58 = vadd.s32 %v764_v54, %v760_v46 }
  0x4d   :  { %v44_v59 = vsel %vm43_vm8, %v42_v10, 0  ;;  %v1991_v2 = vand.u32 3, %v355_v25  ;;  %v575_v50 = vadd.s32 3, %v571_v45  ;;  %v39_v11 = vand.u32 8388607, %v32_v51 }
  0x4e   :  { %v346_v44 = vxor.u32 2147483648, %v345_v30  ;;  %v557_v26 = vor.u32 %v556_v47, %v555_v40  ;;  %v560_v39 = vshll.u32 %v559_v48, 23  ;;  %v766_v63 = vadd.s32 536870912, %v765_v58 }
  0x4f   :  { %v46_v0 = vand.u32 31, %v44_v59  ;;  %vm361_vm9 = vcmp.eq.s32.totalorder %v1991_v2, 2  ;;  %vm470_vm10 = vcmp.eq.s32.totalorder %v1989_v56, 2  ;;  %vm358_vm11 = vcmp.eq.s32.totalorder %v1991_v2, 0 }
  0x50   :  { %v347_v52 = vsel %vm264_vm13, %v346_v44, %v345_v30  ;;  %v561_v61 = vor.u32 4788187, %v560_v39  ;;  %v564_v62 = vcvt.s32.f32 %v557_v26  ;;  %v1995_v55 = vshrl.u32 %v766_v63, 30 }
  0x51   :  { %v350_v23 = vsel %vm1930_vm15, %v1811_v1, %v347_v52  ;;  %v47_v7 = vsub.s32 32, %v46_v0  ;;  %v2000_v12 = vand.u32 3, %v575_v50  ;;  %vm467_vm12 = vcmp.eq.s32.totalorder %v1989_v56, 0 }
  0x52   :  { %1703 = vcosq.f32 %v350_v23  ;;  %v562_v3 = vand.u32 2147483647, %v561_v61  ;;  %v2003_v13 = vand.u32 3, %v571_v45  ;;  %v768_v14 = vshll.u32 %v1995_v55, 30 }
  0x53   :  { %1705 = vsinq.f32 %v350_v23  ;;  %v40_v15 = vor.u32 8388608, %v39_v11  ;;  %vm357_vm13 = vcmp.lt.s32.totalorder %v1991_v2, 2  ;;  %vm466_vm14 = vcmp.lt.s32.totalorder %v1989_v56, 2 }
  0x54   :  { %v565_v9 = vmul.f32 %v564_v62, %v562_v3  ;;  %v49_v16 = vshll.u32 %v1774_v27, %v46_v0  ;;  %v50_v8 = vshrl.u32 %v1775_v29, %v47_v7  ;;  %v52_v17 = vshll.u32 %v1775_v29, %v46_v0 }
  0x55   :  { %vm354_vm15 = vweird.f32 %v1811_v1  ;;  %v2012_v18 = vsub.s32 %v765_v58, %v768_v14  ;;  %v53_v19 = vshrl.u32 %v1776_v31, %v47_v7  ;;  %v55_v53 = vshll.u32 %v1776_v31, %v46_v0 }
  0x56   :  { %v566_v24 = vxor.u32 2147483648, %v565_v9  ;;  %v56_v20 = vshrl.u32 %v1777_v33, %v47_v7  ;;  %v45_v22 = vshrl.u32 %v44_v59, 5  ;;  %v58_v28 = vshll.u32 %v1777_v33, %v46_v0 }
  0x57   :  { %v59_v30 = vshrl.u32 %v1778_v35, %v47_v7  ;;  %v771_v34 = vsub.s32 0, %v2012_v18  ;;  %v61_v37 = vshll.u32 %v1778_v35, %v46_v0  ;;  %v2026_v40 = vshll.u32 %v40_v15, 8 }
  0x58   :  { %v567_v21 = vsel %vm484_vm2, %v566_v24, %v565_v9  ;;  %v48_v41 = vshrl.u32 %v1774_v27, %v47_v7  ;;  %v51_v43 = vor.u32 %v50_v8, %v49_v16  ;;  %v62_v44 = vshrl.u32 %v1779_v42, %v47_v7 }
  0x59   :  { %v570_v32 = vsel %vm1945_vm5, %v1816_v4, %v567_v21  ;;  %v1541_v46 = vmin.u32 %v771_v34, %v2012_v18  ;;  %v54_v38 = vor.u32 %v53_v19, %v52_v17  ;;  %v57_v10 = vor.u32 %v56_v20, %v55_v53 }
  0x5a   :  { %1707 = vcosq.f32 %v570_v32  ;;  %v761_v6 = vadd.s32 %v1960_v57, %v1970_v36  ;;  %v60_v47 = vor.u32 %v59_v30, %v58_v28  ;;  %vm64_vm0 = vcmp.lt.s32.totalorder %v45_v22, 1 }
  0x5b   :  { %1709 = vsinq.f32 %v570_v32  ;;  %vm67_vm1 = vcmp.lt.s32.totalorder %v45_v22, 4  ;;  %v773_v45 = vclz %v1541_v46  ;;  %vm65_vm2 = vcmp.lt.s32.totalorder %v45_v22, 2 }
  0x5c   :  { %v69_v23 = vsel %vm67_vm1, %v57_v10, 2102212464  ;;  %v63_v39 = vor.u32 %v62_v44, %v61_v37  ;;  %vm66_vm3 = vcmp.lt.s32.totalorder %v45_v22, 3  ;;  %v68_v54 = vsel %vm64_vm0, %v48_v41, %v51_v43 }
  0x5d   :  { %v1542_v36 = vadd.s32 4294967294, %v773_v45  ;;  %v72_v59 = vsel %vm64_vm0, %v51_v43, %v54_v38  ;;  %v70_v50 = vsel %vm66_vm3, %v54_v38, %v69_v23  ;;  %v73_v63 = vsel %vm67_vm1, %v60_v47, 920167782 }
  0x5e   :  { %vm689_vm4 = vcmp.lt.s32.totalorder %v2003_v13, 2  ;;  %v74_v3 = vsel %vm66_vm3, %v57_v10, %v73_v63  ;;  %v76_v15 = vsel %vm64_vm0, %v54_v38, %v57_v10  ;;  %v77_v16 = vsel %vm67_vm1, %v63_v39, 1326507024 }
  0x5f   :  { %v1704_v25 = vpop.eup %1703  ;;  %vm1543_vm5 = vcmp.lt.s32.totalorder %v1542_v36, 0  ;;  %v75_v14 = vsel %vm65_vm2, %v72_v59, %v74_v3  ;;  %v78_v17 = vsel %vm66_vm3, %v60_v47, %v77_v16  ;;  %v71_v28 = vsel %vm65_vm2, %v68_v54, %v70_v50 }
  0x60   :  { %v1706_v48 = vpop.eup %1705  ;;  %v362_v52 = vxor.u32 2147483648, %v1704_v25  ;;  %v776_v9 = vsel %vm1543_vm5, 0, %v1542_v36  ;;  %v2063_v19 = vmul.u32.u64.low %v2026_v40, %v75_v14  ;;  %v2064_v53 = vmul.u32.u64.high %v2026_v40, %v75_v14, %v2063_v19 }
  0x61   :  { %v359_v26 = vxor.u32 2147483648, %v1706_v48  ;;  %v777_v2 = vsub.s32 32, %v776_v9  ;;  %v778_v56 = vshll.u32 %v2012_v18, %v776_v9  ;;  %v781_v24 = vsub.s32 4294967266, %v776_v9 }
  0x62   :  { %v363_v58 = vsel %vm361_vm9, %v362_v52, %v1706_v48  ;;  %v472_v57 = vsel %vm470_vm10, %v362_v52, %v1706_v48  ;;  %v79_v30 = vsel %vm65_vm2, %v76_v15, %v78_v17  ;;  %vm690_vm6 = vcmp.eq.s32.totalorder %v2003_v13, 0 }
  0x63   :  { %v360_v61 = vsel %vm358_vm11, %v1704_v25, %v359_v26  ;;  %v469_v62 = vsel %vm467_vm12, %v1704_v25, %v359_v26  ;;  %v779_v20 = vshrl.u32 %v761_v6, %v777_v2  ;;  %v782_v21 = vadd.s32 127, %v781_v24 }
  0x64   :  { %v364_v11 = vsel %vm357_vm13, %v360_v61, %v363_v58  ;;  %v473_v0 = vsel %vm466_vm14, %v469_v62, %v472_v57  ;;  %v2071_v18 = vmul.u32.u64.low %v2026_v40, %v79_v30  ;;  %v2072_v32 = vmul.u32.u64.high %v2026_v40, %v79_v30, %v2071_v18 }
  0x65   :  { %v365_v7 = vsel %vm354_vm15, nan, %v364_v11  ;;  %v474_v8 = vsel %vm354_vm15, nan, %v473_v0  ;;  %vm581_vm7 = vcmp.eq.s32.totalorder %v2000_v12, 2  ;;  %vm693_vm8 = vcmp.eq.s32.totalorder %v2003_v13, 2 }
  0x66   :  { %367 = vrot.lane.b32.xlu0 %v365_v7, %s1780_s0  ;;  %v780_v34 = vor.u32 %v779_v20, %v778_v56  ;;  %v783_v37 = vshll.u32 %v782_v21, 23  ;;  %v1781_v41 = vmov 1   ;;  %vm578_vm9 = vcmp.eq.s32.totalorder %v2000_v12, 0 }
  0x67   :  { %v1708_v1 = vpop.eup %1707  ;;  %1702 = vset.pattern.permute.xlu1 %v1781_v41  ;;  %v87_v44 = vmul.u32 %v2026_v40, %v71_v28  ;;  %v90_v46 = vadd.s32 1, %v2064_v53  ;;  %1701 = vset.pattern.permute.xlu0 %v1781_v41  ;;  %vm577_vm10 = vcmp.lt.s32.totalorder %v2000_v12, 2  ;;  %vm574_vm11 = vweird.f32 %v1816_v4 }
  0x68   :  { %v1710_v43 = vpop.eup %1709  ;;  %v582_v22 = vxor.u32 2147483648, %v1708_v1  ;;  %v784_v10 = vor.u32 4788187, %v783_v37  ;;  %v787_v25 = vcvt.s32.f32 %v780_v34  ;;  %vm89_vm12 = vc.u32 %v2072_v32, %v2063_v19 }
  0x69   :  { %v579_v38 = vxor.u32 2147483648, %v1710_v43  ;;  %v91_v45 = vsel %vm89_vm12, %v90_v46, %v2064_v53  ;;  %vm707_vm13 = vcmp.lt.s32.totalorder %v1819_v5, 0  ;;  %v791_v58 = vsub.s32 4, %v1995_v55 }
  0x6a   :  { %476 = vrot.lane.b32.xlu0 %v474_v8, %s1780_s0  ;;  %v583_v6 = vsel %vm581_vm7, %v582_v22, %v1710_v43  ;;  %v695_v47 = vsel %vm693_vm8, %v582_v22, %v1710_v43  ;;  %v785_v52 = vand.u32 2147483647, %v784_v10  ;;  %v92_v39 = vadd.s32 %v91_v45, %v87_v44 }
  0x6b   :  { %v580_v40 = vsel %vm578_vm9, %v1708_v1, %v579_v38  ;;  %v692_v48 = vsel %vm690_vm6, %v1708_v1, %v579_v38  ;;  %vm706_vm14 = vcmp.le.f32.partialorder %v705_v49, 0.7853982  ;;  %v792_v62 = vsel %vm707_vm13, %v791_v58, %v1995_v55 }
  0x6c   :  { %v584_v23 = vsel %vm577_vm10, %v580_v40, %v583_v6  ;;  %v696_v26 = vsel %vm689_vm4, %v692_v48, %v695_v47  ;;  %v788_v54 = vmul.f32 %v787_v25, %v785_v52  ;;  %v93_v57 = vadd.s32 536870912, %v92_v39 }
  0x6d   :  { %v585_v12 = vsel %vm574_vm11, nan, %v584_v23  ;;  %v697_v36 = vsel %vm574_vm11, nan, %v696_v26  ;;  %v794_v0 = vsel %vm706_vm14, 0, %v792_v62  ;;  %v88_v2 = vadd.s32 %v2063_v19, %v2072_v32 }
  0x6e   :  { %587 = vrot.lane.b32.xlu1 %v585_v12, %s1780_s0  ;;  %v789_v13 = vxor.u32 2147483648, %v788_v54  ;;  %v94_v59 = vshrl.u32 %v93_v57, 30  ;;  %v798_v4 = vadd.s32 3, %v794_v0  ;;  %v914_v14 = vand.u32 3, %v794_v0 }
  0x6f   :  { %vm797_vm6 = vweird.f32 %v1819_v5  ;;  %vm34_vm7 = vcmp.lt.s32.totalorder %v1898_v60, 0  ;;  %vm33_vm8 = vcmp.le.f32.partialorder %v32_v51, 0.7853982  ;;  %vm124_vm12 = vweird.f32 %v1898_v60 }
  0x70   :  { %v790_v61 = vsel %vm707_vm13, %v789_v13, %v788_v54  ;;  %v95_v63 = vshll.u32 %v94_v59, 30  ;;  %v799_v49 = vand.u32 3, %v798_v4  ;;  %vm919_vm0 = vcmp.eq.s32.totalorder %v914_v14, 2 }
  0x71   :  { %v793_v50 = vsel %vm706_vm14, %v1819_v5, %v790_v61  ;;  %vm915_vm3 = vcmp.lt.s32.totalorder %v914_v14, 2  ;;  %vm916_vm4 = vcmp.eq.s32.totalorder %v914_v14, 0  ;;  %v118_v47 = vsub.s32 4, %v94_v59 }
  0x72   :  { %699 = vrot.lane.b32.xlu1 %v697_v36, %s1780_s0  ;;  %1711 = vcosq.f32 %v793_v50  ;;  %v96_v11 = vsub.s32 %v92_v39, %v95_v63  ;;  %vm804_vm1 = vcmp.eq.s32.totalorder %v799_v49, 2  ;;  %vm801_vm2 = vcmp.eq.s32.totalorder %v799_v49, 0 }
  0x73   :  { %1713 = vsinq.f32 %v793_v50  ;;  %vm800_vm5 = vcmp.lt.s32.totalorder %v799_v49, 2  ;;  %v119_v40 = vsel %vm34_vm7, %v118_v47, %v94_v59 }
  0x74   :  { %v98_v3 = vsub.s32 0, %v96_v11  ;;  %v121_v48 = vsel %vm33_vm8, 0, %v119_v40 }
  0x75   :  { %v125_v52 = vand.u32 3, %v121_v48  ;;  %v228_v36 = vadd.s32 3, %v121_v48 }
  0x76   :  { %v1516_v7 = vmin.u32 %v98_v3, %v96_v11 }
  0x77   :  { %vm130_vm9 = vcmp.eq.s32.totalorder %v125_v52, 2  ;;  %vm127_vm10 = vcmp.eq.s32.totalorder %v125_v52, 0  ;;  %vm126_vm11 = vcmp.lt.s32.totalorder %v125_v52, 2  ;;  %v229_v13 = vand.u32 3, %v228_v36  ;;  %v1222_v36 = vld [vmem:[#allocation2 + $0xd0] sm:$0xff] }
  0x78   :  { %v100_v9 = vclz %v1516_v7 }
  0x79   :  { %vm231_vm13 = vcmp.eq.s32.totalorder %v229_v13, 0  ;;  %vm234_vm14 = vcmp.eq.s32.totalorder %v229_v13, 2 }
  0x7a   :  { %v1517_v15 = vadd.s32 4294967294, %v100_v9 }
  0x7c   :  { %vm1518_vm15 = vcmp.lt.s32.totalorder %v1517_v15, 0 }
  0x7d   :  { %v103_v55 = vsel %vm1518_vm15, 0, %v1517_v15  ;;  %vm230_vm15 = vcmp.lt.s32.totalorder %v229_v13, 2  ;;  %v1221_v13 = vld [vmem:[#allocation2 + $0xc8] sm:$0xff] }
  0x7e   :  { %v104_v24 = vsub.s32 32, %v103_v55  ;;  %v105_v16 = vshll.u32 %v96_v11, %v103_v55  ;;  %v108_v8 = vsub.s32 4294967266, %v103_v55 }
  0x7f   :  { %v1712_v56 = vpop.eup %1711 }
  0x80   :  { %v1714_v17 = vpop.eup %1713  ;;  %v805_v53 = vxor.u32 2147483648, %v1712_v56  ;;  %v106_v21 = vshrl.u32 %v88_v2, %v104_v24  ;;  %v109_v28 = vadd.s32 127, %v108_v8 }
  0x81   :  { %v802_v20 = vxor.u32 2147483648, %v1714_v17 }
  0x82   :  { %v806_v19 = vsel %vm804_vm1, %v805_v53, %v1714_v17  ;;  %v921_v30 = vsel %vm919_vm0, %v805_v53, %v1714_v17  ;;  %v107_v1 = vor.u32 %v106_v21, %v105_v16  ;;  %v110_v34 = vshll.u32 %v109_v28, 23 }
  0x83   :  { %v803_v18 = vsel %vm801_vm2, %v1712_v56, %v802_v20  ;;  %v918_v32 = vsel %vm916_vm4, %v1712_v56, %v802_v20  ;;  %vm1783_vm0 = vmmov 0  }
  0x84   :  { %v807_v37 = vsel %vm800_vm5, %v803_v18, %v806_v19  ;;  %v922_v41 = vsel %vm915_vm3, %v918_v32, %v921_v30  ;;  %v111_v44 = vor.u32 4788187, %v110_v34  ;;  %v114_v46 = vcvt.s32.f32 %v107_v1 }
  0x85   :  { %v808_v43 = vsel %vm797_vm6, nan, %v807_v37  ;;  %v923_v22 = vsel %vm797_vm6, nan, %v922_v41 }
  0x86   :  { %810 = vrot.lane.b32.xlu0 %v808_v43, %s1780_s0  ;;  %925 = vrot.lane.b32.xlu1 %v923_v22, %s1780_s0  ;;  %v112_v38 = vand.u32 2147483647, %v111_v44 }
  0x88   :  { %v115_v10 = vmul.f32 %v114_v46, %v112_v38 }
  0x8a   :  { %v116_v5 = vxor.u32 2147483648, %v115_v10 }
  0x8c   :  { %v117_v25 = vsel %vm34_vm7, %v116_v5, %v115_v10 }
  0x8d   :  { %v120_v6 = vsel %vm33_vm8, %v1898_v60, %v117_v25 }
  0x8e   :  { %1715 = vcosq.f32 %v120_v6 }
  0x8f   :  { %1717 = vsinq.f32 %v120_v6 }
  0x9b   :  { %v1716_v45 = vpop.eup %1715 }
  0x9c   :  { %v1718_v23 = vpop.eup %1717  ;;  %v131_v26 = vxor.u32 2147483648, %v1716_v45 }
  0x9d   :  { %v128_v39 = vxor.u32 2147483648, %v1718_v23 }
  0x9e   :  { %v132_v51 = vsel %vm130_vm9, %v131_v26, %v1718_v23  ;;  %v236_v61 = vsel %vm234_vm14, %v131_v26, %v1718_v23 }
  0x9f   :  { %v129_v12 = vsel %vm127_vm10, %v1716_v45, %v128_v39  ;;  %v233_v59 = vsel %vm231_vm13, %v1716_v45, %v128_v39  ;;  %v1227_v39 = vld [vmem:[#allocation2 + $0xf8] sm:$0xff] }
  0xa0   :  { %v133_v54 = vsel %vm126_vm11, %v129_v12, %v132_v51  ;;  %v237_v62 = vsel %vm230_vm15, %v233_v59, %v236_v61  ;;  %v1782_v51 = vmov 0.0   ;;  %v1226_v12 = vld [vmem:[#allocation2 + $0xf0] sm:$0xff]  ;;  %v1220_v59 = vld [vmem:[#allocation2 + $0xc0] sm:$0xff]  ;;  %v1219_v61 = vld [vmem:[#allocation2 + $0xb8] sm:$0xff] }
  0xa1   :  { %v134_v58 = vsel %vm124_vm12, nan, %v133_v54  ;;  %v238_v50 = vsel %vm124_vm12, nan, %v237_v62  ;;  %1593 = vmatprep.subr.mxu0 %v1782_v51  ;;  %1625 = vmatprep.mubr.msk.f32.mxu0 %vm1783_vm0, %v1782_v51  ;;  %v1225_v54 = vld [vmem:[#allocation2 + $0xe8] sm:$0xff]  ;;  %v1218_v62 = vld [vmem:[#allocation2 + $0xb0] sm:$0xff] }
  0xa2   :  { %v371_v57 = vmul.f32 0.48860252, %v134_v58  ;;  %v239_v63 = vmul.f32 -1.0, %v238_v50  ;;  %v244_v0 = vmul.f32 3.0, %v134_v58  ;;  %v240_v60 = vmul.f32 %v238_v50, %v238_v50  ;;  %1594 = vmatpush3.msra.mxu0 %v1227_v39  ;;  %1628 = vmatprep.subr.mxu1 %v1782_v51 }
  0xa3   :  { %v246_v17 = vmul.f32 5.0, %v134_v58  ;;  %v253_v19 = vmul.f32 2.0, %v134_v58  ;;  %1595 = vmatprep.subr.mxu0 %v1782_v51  ;;  %1660 = vmatprep.mubr.msk.f32.mxu1 %vm1783_vm0, %v1782_v51 }
  0xa4   :  { %949 = vperm.xlu1 %1702, %v371_v57   ;;  %v261_v11 = vmul.f32 0.48860252, %v239_v63  ;;  %v248_v7 = vmul.f32 %v244_v0, %v134_v58  ;;  %v245_v9 = vmul.f32 %v244_v0, %v239_v63  ;;  %v241_v14 = vmul.f32 3.0, %v240_v60  ;;  %1596 = vmatpush3.msra.mxu0 %v1226_v12  ;;  %v1224_v58 = vld [vmem:[#allocation2 + $0xe0] sm:$0xff]  ;;  %v1223_v57 = vld [vmem:[#allocation2 + $0xd8] sm:$0xff]  ;;  %v1214_v0 = vld [vmem:[#allocation2 + $0x90] sm:$0xff] }
  0xa5   :  { %v258_v22 = vmul.f32 3.0, %v239_v63  ;;  %v242_v44 = vmul.f32 %v240_v60, %v238_v50  ;;  %1597 = vmatprep.subr.mxu0 %v1782_v51  ;;  %v1217_v50 = vld [vmem:[#allocation2 + $0xa8] sm:$0xff]  ;;  %v1216_v63 = vld [vmem:[#allocation2 + $0xa0] sm:$0xff] }
  0xa6   :  { %v591_v15 = vmul.f32 0.3641828, %v245_v9  ;;  %v1523_v55 = vadd.f32 -1.0, %v248_v7  ;;  %v480_v56 = vmul.f32 0.1820914, %v241_v14  ;;  %v247_v18 = vmul.f32 %v246_v17, %v241_v14  ;;  %1598 = vmatpush3.msra.mxu0 %v1225_v54  ;;  %v1212_v60 = vld [vmem:[#allocation2 + $0x80] sm:$0xff] }
  0xa7   :  { %v257_v43 = vmul.f32 %v246_v17, %v245_v9  ;;  %v243_v10 = vmul.f32 -15.0, %v242_v44  ;;  %1599 = vmatprep.subr.mxu0 %v1782_v51 }
  0xa8   :  { %v251_v16 = vmul.f32 0.5, %v1523_v55  ;;  %v814_v34 = vmul.f32 0.09635372, %v247_v18  ;;  %1600 = vmatpush3.msra.mxu0 %v1224_v58 }
  0xa9   :  { %v259_v38 = vsub.f32 %v257_v43, %v258_v22  ;;  %v703_v6 = vmul.f32 0.039336238, %v243_v10  ;;  %1601 = vmatprep.subr.mxu0 %v1782_v51 }
  0xaa   :  { %v593_v21 = vmul.f32 0.63078314, %v251_v16  ;;  %v252_v28 = vmul.f32 %v251_v16, %v246_v17  ;;  %1602 = vmatpush3.msra.mxu0 %v1223_v57 }
  0xab   :  { %v260_v25 = vmul.f32 0.5, %v259_v38  ;;  %1603 = vmatprep.subr.mxu0 %v1782_v51 }
  0xac   :  { %v254_v1 = vsub.f32 %v252_v28, %v253_v19  ;;  %1604 = vmatpush3.msra.mxu0 %v1222_v36 }
  0xad   :  { %v816_v40 = vmul.f32 0.3046972, %v260_v25  ;;  %1605 = vmatprep.subr.mxu0 %v1782_v51 }
  0xae   :  { %v256_v37 = vmul.f32 0.33333334, %v254_v1  ;;  %1606 = vmatpush3.msra.mxu0 %v1221_v13 }
  0xaf   :  { %1607 = vmatprep.subr.mxu0 %v1782_v51 }
  0xb0   :  { %v818_v46 = vmul.f32 0.7463527, %v256_v37  ;;  %1608 = vmatpush3.msra.mxu0 %v1220_v59 }
  0xb1   :  { %1609 = vmatprep.subr.mxu0 %v1782_v51 }
  0xb2   :  { %1610 = vmatpush3.msra.mxu0 %v1219_v61 }
  0xb3   :  { %1611 = vmatprep.subr.mxu0 %v1782_v51 }
  0xb4   :  { %1612 = vmatpush3.msra.mxu0 %v1218_v62 }
  0xb5   :  { %1613 = vmatprep.subr.mxu0 %v1782_v51 }
  0xb6   :  { %1614 = vmatpush3.msra.mxu0 %v1217_v50 }
  0xb7   :  { %1615 = vmatprep.subr.mxu0 %v1782_v51 }
  0xb8   :  { %1616 = vmatpush3.msra.mxu0 %v1216_v63 }
  0xb9   :  { %1617 = vmatprep.subr.mxu0 %v1782_v51 }
  0xd8   :  { %v368_v3 = vpop.permute.xlu0 %367 }
  0xd9   :  { %v370_v4 = vmul.f32 %v368_v3, %v261_v11  ;;  %v592_v24 = vmul.f32 %v591_v15, %v368_v3  ;;  %v817_v52 = vmul.f32 %v816_v40, %v368_v3  ;;  %v1213_v3 = vld [vmem:[#allocation2 + $0x88] sm:$0xff] }
  0xdb   :  { %938 = vperm.xlu0 %1701, %v370_v4   ;;  %v931_v4 = vlaneseq }
  0xdc   :  { %v477_v49 = vpop.permute.xlu0 %476 }
  0xdd   :  { %v479_v2 = vmul.f32 %v477_v49, %v261_v11  ;;  %v594_v20 = vmul.f32 %v591_v15, %v477_v49  ;;  %v819_v23 = vmul.f32 %v816_v40, %v477_v49  ;;  %v1215_v11 = vld [vmem:[#allocation2 + $0x98] sm:$0xff]  ;;  %v2135_v7 = vshrl.u32 %v931_v4, 7  ;;  %v929_v49 = vld [vmem:[#allocation2] sm:$0xff] }
  0xde   :  { %1618 = vmatpush3.msra.mxu0 %v1215_v11 }
  0xdf   :  { %960 = vperm.xlu1 %1702, %v479_v2   ;;  %1619 = vmatprep.subr.mxu0 %v1782_v51  ;;  %v933_v9 = vsub.s32 0, %v2135_v7  ;;  %v943_v14 = vsub.s32 1, %v2135_v7  ;;  %v965_v17 = vsub.s32 3, %v2135_v7  ;;  %v987_v1 = vsub.s32 5, %v2135_v7 }
  0xe0   :  { %v588_v8 = vpop.permute.xlu1 %587  ;;  %1620 = vmatpush3.msra.mxu0 %v1214_v0 }
  0xe1   :  { %v590_v53 = vmul.f32 %v588_v8, %v480_v56  ;;  %v815_v41 = vmul.f32 %v814_v34, %v588_v8  ;;  %1621 = vmatprep.subr.mxu0 %v1782_v51  ;;  %v934_v15 = vrot.slane %v929_v49, %v933_v9  ;;  %v944_v2 = vrot.slane %v929_v49, %v943_v14 }
  0xe2   :  { %1622 = vmatpush3.msra.mxu0 %v1213_v3  ;;  %v988_v43 = vrot.slane %v929_v49, %v987_v1 }
  0xe3   :  { %982 = vperm.xlu1 %1702, %v592_v24   ;;  %971 = vperm.xlu0 %1701, %v590_v53   ;;  %v935_v16 = vmul.f32 0.2820948, %v934_v15 }
  0xe4   :  { %v700_v30 = vpop.permute.xlu1 %699  ;;  %1623 = vmatprep.subr.mxu0 %v1782_v51 }
  0xe5   :  { %v702_v32 = vmul.f32 %v700_v30, %v480_v56  ;;  %v820_v5 = vmul.f32 %v814_v34, %v700_v30  ;;  %1624 = vmatpush3.msra.mxu0 %v1212_v60  ;;  %v954_v56 = vsub.s32 2, %v2135_v7  ;;  %v976_v30 = vsub.s32 4, %v2135_v7 }
  0xe7   :  { %1004 = vperm.xlu1 %1702, %v594_v20   ;;  %993 = vperm.xlu0 %1701, %v593_v21   ;;  %v955_v53 = vrot.slane %v929_v49, %v954_v56  ;;  %v966_v21 = vrot.slane %v929_v49, %v965_v17  ;;  %v977_v34 = vrot.slane %v929_v49, %v976_v30 }
  0xeb   :  { %1015 = vperm.xlu0 %1701, %v702_v32  }
  0xef   :  { %1037 = vperm.xlu0 %1701, %v815_v41  }
  0xf3   :  { %1059 = vperm.xlu0 %1701, %v818_v46   ;;  %v998_v46 = vsub.s32 6, %v2135_v7 }
  0xf7   :  { %1081 = vperm.xlu0 %1701, %v820_v5   ;;  %v1009_v5 = vsub.s32 7, %v2135_v7 }
  0xf8   :  { %v811_v47 = vpop.permute.xlu0 %810  ;;  %v926_v45 = vpop.permute.xlu1 %925 }
  0xf9   :  { %v813_v48 = vmul.f32 %v811_v47, %v703_v6  ;;  %v928_v26 = vmul.f32 %v926_v45, %v703_v6  ;;  %v999_v6 = vrot.slane %v929_v49, %v998_v46  ;;  %v1010_v40 = vrot.slane %v929_v49, %v1009_v5  ;;  %v930_v45 = vld [vmem:[#allocation2 + $0x8] sm:$0xff] }
  0xfa   :  { %v1021_v12 = vrot.slane %v930_v45, %v933_v9  ;;  %v1032_v36 = vrot.slane %v930_v45, %v943_v14  ;;  %v1043_v13 = vrot.slane %v930_v45, %v954_v56  ;;  %v1054_v50 = vrot.slane %v930_v45, %v965_v17 }
  0xfb   :  { %1026 = vperm.xlu1 %1702, %v813_v48   ;;  %v1065_v3 = vrot.slane %v930_v45, %v976_v30  ;;  %v1076_v49 = vrot.slane %v930_v45, %v987_v1  ;;  %v1087_v9 = vrot.slane %v930_v45, %v998_v46  ;;  %v1098_v56 = vrot.slane %v930_v45, %v1009_v5 }
  0xff   :  { %1048 = vperm.xlu1 %1702, %v817_v52  }
 0x103   :  { %1070 = vperm.xlu1 %1702, %v819_v23  }
 0x107   :  { %1092 = vperm.xlu1 %1702, %v928_v26  }
 0x11f   :  { %v950_v24 = vpop.permute.xlu1 %949 }
 0x120   :  { %v956_v19 = vmul.f32 %v955_v53, %v950_v24 }
 0x156   :  { %v939_v55 = vpop.permute.xlu0 %938 }
 0x157   :  { %v945_v8 = vmul.f32 %v944_v2, %v939_v55 }
 0x159   :  { %v946_v20 = vadd.f32 %v945_v8, %v935_v16 }
 0x15a   :  { %v961_v28 = vpop.permute.xlu1 %960 }
 0x15b   :  { %v957_v18 = vadd.f32 %v956_v19, %v946_v20  ;;  %v967_v32 = vmul.f32 %v966_v21, %v961_v28  ;;  %v1548_v28 = vld [vmem:[%s2238_s2] ss:$0 sm:$0xff] }
 0x15d   :  { %v968_v41 = vadd.f32 %v967_v32, %v957_v18 }
 0x15e   :  { %v972_v37 = vpop.permute.xlu0 %971  ;;  %v983_v22 = vpop.permute.xlu1 %982 }
 0x15f   :  { %v978_v44 = vmul.f32 %v977_v34, %v972_v37  ;;  %v989_v10 = vmul.f32 %v988_v43, %v983_v22 }
 0x161   :  { %v979_v38 = vadd.f32 %v978_v44, %v968_v41 }
 0x162   :  { %v994_v25 = vpop.permute.xlu0 %993  ;;  %v1005_v48 = vpop.permute.xlu1 %1004 }
 0x163   :  { %v990_v47 = vadd.f32 %v989_v10, %v979_v38  ;;  %v1000_v52 = vmul.f32 %v999_v6, %v994_v25  ;;  %v1011_v39 = vmul.f32 %v1010_v40, %v1005_v48 }
 0x165   :  { %v1001_v26 = vadd.f32 %v1000_v52, %v990_v47 }
 0x166   :  { %v1016_v23 = vpop.permute.xlu0 %1015 }
 0x167   :  { %v1012_v54 = vadd.f32 %v1011_v39, %v1001_v26  ;;  %v1022_v57 = vmul.f32 %v1021_v12, %v1016_v23 }
 0x169   :  { %v1023_v59 = vadd.f32 %v1022_v57, %v1012_v54 }
 0x16a   :  { %v1038_v58 = vpop.permute.xlu0 %1037 }
 0x16b   :  { %v1044_v11 = vmul.f32 %v1043_v13, %v1038_v58 }
 0x16e   :  { %v1060_v63 = vpop.permute.xlu0 %1059 }
 0x16f   :  { %v1066_v15 = vmul.f32 %v1065_v3, %v1060_v63 }
 0x172   :  { %v1082_v55 = vpop.permute.xlu0 %1081 }
 0x173   :  { %v1088_v8 = vmul.f32 %v1087_v9, %v1082_v55 }
 0x176   :  { %v1027_v61 = vpop.permute.xlu1 %1026 }
 0x177   :  { %v1033_v62 = vmul.f32 %v1032_v36, %v1027_v61 }
 0x179   :  { %v1034_v0 = vadd.f32 %v1033_v62, %v1023_v59 }
 0x17a   :  { %v1049_v60 = vpop.permute.xlu1 %1048 }
 0x17b   :  { %v1045_v4 = vadd.f32 %v1044_v11, %v1034_v0  ;;  %v1055_v7 = vmul.f32 %v1054_v50, %v1049_v60 }
 0x17d   :  { %v1056_v2 = vadd.f32 %v1055_v7, %v1045_v4 }
 0x17e   :  { %v1071_v24 = vpop.permute.xlu1 %1070 }
 0x17f   :  { %v1067_v16 = vadd.f32 %v1066_v15, %v1056_v2  ;;  %v1077_v14 = vmul.f32 %v1076_v49, %v1071_v24 }
 0x181   :  { %v1078_v53 = vadd.f32 %v1077_v14, %v1067_v16 }
 0x182   :  { %v1093_v20 = vpop.permute.xlu1 %1092 }
 0x183   :  { %v1089_v17 = vadd.f32 %v1088_v8, %v1078_v53  ;;  %v1099_v21 = vmul.f32 %v1098_v56, %v1093_v20 }
 0x185   :  { %v1100_v19 = vadd.f32 %v1099_v21, %v1089_v17 }
 0x187   :  { %v2148_v30 = vadd.f32 %v1548_v28, %v1100_v19 }
 0x189   :  { %v1110_v18 = vand.u32 2139095040, %v2148_v30  ;;  %v1107_v37 = vand.u32 2147483647, %v2148_v30  ;;  %vm1109_vm8 = vcmp.lt.s32.totalorder %v2148_v30, 0  ;;  %vm1199_vm13 = vweird.f32 %v2148_v30 }
 0x18b   :  { %v1111_v32 = vshrl.u32 %v1110_v18, 23  ;;  %v1114_v44 = vand.u32 8388607, %v1107_v37  ;;  %vm1108_vm9 = vcmp.le.f32.partialorder %v1107_v37, 0.7853982 }
 0x18d   :  { %v1549_v1 = vadd.s32 4294967169, %v1111_v32  ;;  %v1115_v23 = vor.u32 8388608, %v1114_v44 }
 0x18f   :  { %v1117_v34 = vadd.s32 1, %v1549_v1  ;;  %v1155_v11 = vshll.u32 %v1115_v23, 8 }
 0x191   :  { %vm1118_vm1 = vcmp.gt.s32.totalorder %v1117_v34, 0 }
 0x192   :  { %v1119_v41 = vsel %vm1118_vm1, %v1117_v34, 0 }
 0x193   :  { %v1121_v43 = vand.u32 31, %v1119_v41  ;;  %v1120_v46 = vshrl.u32 %v1119_v41, 5 }
 0x195   :  { %v1122_v22 = vsub.s32 32, %v1121_v43  ;;  %v1124_v38 = vshll.u32 %v1774_v27, %v1121_v43  ;;  %v1127_v10 = vshll.u32 %v1775_v29, %v1121_v43  ;;  %v1130_v6 = vshll.u32 %v1776_v31, %v1121_v43 }
 0x196   :  { %v1133_v40 = vshll.u32 %v1777_v33, %v1121_v43  ;;  %v1136_v52 = vshll.u32 %v1778_v35, %v1121_v43  ;;  %vm1139_vm2 = vcmp.lt.s32.totalorder %v1120_v46, 1  ;;  %vm1142_vm3 = vcmp.lt.s32.totalorder %v1120_v46, 4 }
 0x197   :  { %v1125_v5 = vshrl.u32 %v1775_v29, %v1122_v22  ;;  %v1128_v25 = vshrl.u32 %v1776_v31, %v1122_v22  ;;  %v1131_v47 = vshrl.u32 %v1777_v33, %v1122_v22  ;;  %v1134_v48 = vshrl.u32 %v1778_v35, %v1122_v22 }
 0x198   :  { %v1137_v45 = vshrl.u32 %v1779_v42, %v1122_v22  ;;  %v1123_v59 = vshrl.u32 %v1774_v27, %v1122_v22  ;;  %vm1141_vm4 = vcmp.lt.s32.totalorder %v1120_v46, 3  ;;  %vm1140_vm5 = vcmp.lt.s32.totalorder %v1120_v46, 2 }
 0x199   :  { %v1126_v26 = vor.u32 %v1125_v5, %v1124_v38  ;;  %v1129_v39 = vor.u32 %v1128_v25, %v1127_v10  ;;  %v1132_v12 = vor.u32 %v1131_v47, %v1130_v6  ;;  %v1135_v54 = vor.u32 %v1134_v48, %v1133_v40 }
 0x19a   :  { %v1138_v58 = vor.u32 %v1137_v45, %v1136_v52 }
 0x19b   :  { %v1144_v57 = vsel %vm1142_vm3, %v1132_v12, 2102212464  ;;  %v1147_v36 = vsel %vm1139_vm2, %v1126_v26, %v1129_v39  ;;  %v1151_v13 = vsel %vm1139_vm2, %v1129_v39, %v1132_v12  ;;  %v1148_v61 = vsel %vm1142_vm3, %v1135_v54, 920167782 }
 0x19c   :  { %v1152_v62 = vsel %vm1142_vm3, %v1138_v58, 1326507024  ;;  %v1149_v50 = vsel %vm1141_vm4, %v1132_v12, %v1148_v61  ;;  %v1143_v0 = vsel %vm1139_vm2, %v1123_v59, %v1126_v26  ;;  %v1145_v3 = vsel %vm1141_vm4, %v1129_v39, %v1144_v57  ;;  %v1423_v59 = vld [vmem:[#allocation2 + $0x178] sm:$0xff]  ;;  %v1422_v61 = vld [vmem:[#allocation2 + $0x170] sm:$0xff] }
 0x19d   :  { %v1153_v63 = vsel %vm1141_vm4, %v1135_v54, %v1152_v62  ;;  %v1150_v60 = vsel %vm1140_vm5, %v1147_v36, %v1149_v50  ;;  %v1146_v9 = vsel %vm1140_vm5, %v1143_v0, %v1145_v3  ;;  %1629 = vmatpush3.msra.mxu1 %v1423_v59  ;;  %v1421_v62 = vld [vmem:[#allocation2 + $0x168] sm:$0xff]  ;;  %v1420_v50 = vld [vmem:[#allocation2 + $0x160] sm:$0xff]  ;;  %v1415_v3 = vld [vmem:[#allocation2 + $0x138] sm:$0xff] }
 0x19e   :  { %v1154_v4 = vsel %vm1140_vm5, %v1151_v13, %v1153_v63  ;;  %v2168_v15 = vmul.u32.u64.low %v1155_v11, %v1150_v60  ;;  %v2169_v2 = vmul.u32.u64.high %v1155_v11, %v1150_v60, %v2168_v15  ;;  %v1162_v24 = vmul.u32 %v1155_v11, %v1146_v9  ;;  %1630 = vmatprep.subr.mxu1 %v1782_v51  ;;  %v1418_v63 = vld [vmem:[#allocation2 + $0x150] sm:$0xff]  ;;  %v1416_v0 = vld [vmem:[#allocation2 + $0x140] sm:$0xff] }
 0x19f   :  { %v2165_v7 = vmul.u32.u64.low %v1155_v11, %v1154_v4  ;;  %v2166_v49 = vmul.u32.u64.high %v1155_v11, %v1154_v4, %v2165_v7  ;;  %1631 = vmatpush3.msra.mxu1 %v1422_v61  ;;  %v1417_v11 = vld [vmem:[#allocation2 + $0x148] sm:$0xff]  ;;  %v1414_v60 = vld [vmem:[#allocation2 + $0x130] sm:$0xff]  ;;  %v1408_v9 = vld [vmem:[#allocation2 + $0x100] sm:$0xff] }
 0x1a0   :  { %v1165_v55 = vadd.s32 1, %v2169_v2  ;;  %1632 = vmatprep.subr.mxu1 %v1782_v51  ;;  %v1413_v4 = vld [vmem:[#allocation2 + $0x128] sm:$0xff]  ;;  %v1412_v7 = vld [vmem:[#allocation2 + $0x120] sm:$0xff] }
 0x1a1   :  { %vm1164_vm6 = vc.u32 %v2166_v49, %v2168_v15  ;;  %v1163_v32 = vadd.s32 %v2168_v15, %v2166_v49  ;;  %1633 = vmatpush3.msra.mxu1 %v1421_v62  ;;  %v1411_v49 = vld [vmem:[#allocation2 + $0x118] sm:$0xff]  ;;  %v1410_v15 = vld [vmem:[#allocation2 + $0x110] sm:$0xff] }
 0x1a2   :  { %v1166_v16 = vsel %vm1164_vm6, %v1165_v55, %v2169_v2  ;;  %1634 = vmatprep.subr.mxu1 %v1782_v51  ;;  %v1409_v2 = vld [vmem:[#allocation2 + $0x108] sm:$0xff]  ;;  %v1553_v55 = vld [vmem:[%s2238_s2 + $0x1] ss:$0 sm:$0xff] }
 0x1a3   :  { %v1167_v14 = vadd.s32 %v1166_v16, %v1162_v24  ;;  %1635 = vmatpush3.msra.mxu1 %v1420_v50 }
 0x1a4   :  { %1636 = vmatprep.subr.mxu1 %v1782_v51 }
 0x1a5   :  { %v1168_v56 = vadd.s32 536870912, %v1167_v14 }
 0x1a7   :  { %v1169_v8 = vshrl.u32 %v1168_v56, 30 }
 0x1a9   :  { %v1170_v53 = vshll.u32 %v1169_v8, 30  ;;  %v1193_v47 = vsub.s32 4, %v1169_v8 }
 0x1ab   :  { %v1171_v20 = vsub.s32 %v1167_v14, %v1170_v53  ;;  %v1194_v52 = vsel %vm1109_vm8, %v1193_v47, %v1169_v8 }
 0x1ac   :  { %v1196_v45 = vsel %vm1108_vm9, 0, %v1194_v52 }
 0x1ad   :  { %v1173_v17 = vsub.s32 0, %v1171_v20  ;;  %v1200_v23 = vadd.s32 3, %v1196_v45 }
 0x1af   :  { %v1550_v21 = vmin.u32 %v1173_v17, %v1171_v20  ;;  %v1201_v26 = vand.u32 3, %v1200_v23 }
 0x1b1   :  { %v1175_v28 = vclz %v1550_v21  ;;  %vm1206_vm10 = vcmp.eq.s32.totalorder %v1201_v26, 2  ;;  %vm1203_vm11 = vcmp.eq.s32.totalorder %v1201_v26, 0  ;;  %vm1202_vm12 = vcmp.lt.s32.totalorder %v1201_v26, 2 }
 0x1b3   :  { %v1551_v19 = vadd.s32 4294967294, %v1175_v28 }
 0x1b5   :  { %vm1552_vm7 = vcmp.lt.s32.totalorder %v1551_v19, 0 }
 0x1b6   :  { %v1178_v18 = vsel %vm1552_vm7, 0, %v1551_v19 }
 0x1b7   :  { %v1179_v1 = vsub.s32 32, %v1178_v18  ;;  %v1183_v34 = vsub.s32 4294967266, %v1178_v18  ;;  %v1180_v41 = vshll.u32 %v1171_v20, %v1178_v18 }
 0x1b9   :  { %v1181_v43 = vshrl.u32 %v1163_v32, %v1179_v1  ;;  %v1184_v22 = vadd.s32 127, %v1183_v34 }
 0x1bb   :  { %v1182_v44 = vor.u32 %v1181_v43, %v1180_v41  ;;  %v1185_v46 = vshll.u32 %v1184_v22, 23 }
 0x1bd   :  { %v1186_v38 = vor.u32 4788187, %v1185_v46  ;;  %v1189_v5 = vcvt.s32.f32 %v1182_v44 }
 0x1bf   :  { %v1187_v10 = vand.u32 2147483647, %v1186_v38 }
 0x1c1   :  { %v1190_v25 = vmul.f32 %v1189_v5, %v1187_v10 }
 0x1c3   :  { %v1191_v6 = vxor.u32 2147483648, %v1190_v25 }
 0x1c5   :  { %v1192_v40 = vsel %vm1109_vm8, %v1191_v6, %v1190_v25 }
 0x1c6   :  { %v1195_v48 = vsel %vm1108_vm9, %v2148_v30, %v1192_v40  ;;  %v1419_v30 = vld [vmem:[#allocation2 + $0x158] sm:$0xff] }
 0x1c7   :  { %1719 = vcosq.f32 %v1195_v48  ;;  %1637 = vmatpush3.msra.mxu1 %v1419_v30 }
 0x1c8   :  { %1721 = vsinq.f32 %v1195_v48  ;;  %1638 = vmatprep.subr.mxu1 %v1782_v51 }
 0x1c9   :  { %1639 = vmatpush3.msra.mxu1 %v1418_v63 }
 0x1ca   :  { %1640 = vmatprep.subr.mxu1 %v1782_v51 }
 0x1cb   :  { %1641 = vmatpush3.msra.mxu1 %v1417_v11 }
 0x1cc   :  { %1642 = vmatprep.subr.mxu1 %v1782_v51 }
 0x1cd   :  { %1643 = vmatpush3.msra.mxu1 %v1416_v0 }
 0x1ce   :  { %1644 = vmatprep.subr.mxu1 %v1782_v51 }
 0x1cf   :  { %1645 = vmatpush3.msra.mxu1 %v1415_v3 }
 0x1d0   :  { %1646 = vmatprep.subr.mxu1 %v1782_v51 }
 0x1d1   :  { %1647 = vmatpush3.msra.mxu1 %v1414_v60 }
 0x1d2   :  { %1648 = vmatprep.subr.mxu1 %v1782_v51 }
 0x1d3   :  { %1649 = vmatpush3.msra.mxu1 %v1413_v4 }
 0x1d4   :  { %v1720_v39 = vpop.eup %1719  ;;  %1650 = vmatprep.subr.mxu1 %v1782_v51 }
 0x1d5   :  { %v1722_v12 = vpop.eup %1721  ;;  %v1207_v54 = vxor.u32 2147483648, %v1720_v39  ;;  %1651 = vmatpush3.msra.mxu1 %v1412_v7 }
 0x1d6   :  { %v1204_v58 = vxor.u32 2147483648, %v1722_v12  ;;  %1652 = vmatprep.subr.mxu1 %v1782_v51 }
 0x1d7   :  { %v1208_v57 = vsel %vm1206_vm10, %v1207_v54, %v1722_v12  ;;  %1653 = vmatpush3.msra.mxu1 %v1411_v49 }
 0x1d8   :  { %v1205_v36 = vsel %vm1203_vm11, %v1720_v39, %v1204_v58  ;;  %1654 = vmatprep.subr.mxu1 %v1782_v51 }
 0x1d9   :  { %v1209_v37 = vsel %vm1202_vm12, %v1205_v36, %v1208_v57  ;;  %1655 = vmatpush3.msra.mxu1 %v1410_v15 }
 0x1da   :  { %v1210_v13 = vsel %vm1199_vm13, nan, %v1209_v37  ;;  %1656 = vmatprep.subr.mxu1 %v1782_v51 }
 0x1db   :  { %1626 = vmatmul.mubr.f32.vlgmr.msra.gmra.mxu0 %v1210_v13  ;;  %1657 = vmatpush3.msra.mxu1 %v1409_v2 }
 0x1dc   :  { %1658 = vmatprep.subr.mxu1 %v1782_v51 }
 0x1dd   :  { %1659 = vmatpush3.msra.mxu1 %v1408_v9 }
 0x29b   :  { %v1299_v24 = vpop.f32.mrf.mxu0 }
 0x29c   :  { %v2198_v16 = vadd.f32 %v1553_v55, %v1299_v24 }
 0x29d   :  { %v1627_v14 = vpop.f32.mrf.mxu0 }
 0x29e   :  { %v1306_v56 = vand.u32 2139095040, %v2198_v16  ;;  %v1303_v17 = vand.u32 2147483647, %v2198_v16  ;;  %vm1305_vm5 = vcmp.lt.s32.totalorder %v2198_v16, 0  ;;  %vm1395_vm10 = vweird.f32 %v2198_v16 }
 0x2a0   :  { %v1307_v8 = vshrl.u32 %v1306_v56, 23  ;;  %v1310_v51 = vand.u32 8388607, %v1303_v17  ;;  %vm1304_vm6 = vcmp.le.f32.partialorder %v1303_v17, 0.7853982 }
 0x2a2   :  { %v1554_v53 = vadd.s32 4294967169, %v1307_v8  ;;  %v1311_v5 = vor.u32 8388608, %v1310_v51 }
 0x2a4   :  { %v1313_v20 = vadd.s32 1, %v1554_v53 }
 0x2a6   :  { %vm1314_vm14 = vcmp.gt.s32.totalorder %v1313_v20, 0 }
 0x2a7   :  { %v1315_v21 = vsel %vm1314_vm14, %v1313_v20, 0 }
 0x2a8   :  { %v1317_v28 = vand.u32 31, %v1315_v21  ;;  %v1316_v18 = vshrl.u32 %v1315_v21, 5 }
 0x2aa   :  { %v1318_v19 = vsub.s32 32, %v1317_v28  ;;  %v1320_v32 = vshll.u32 %v1774_v27, %v1317_v28  ;;  %v1323_v1 = vshll.u32 %v1775_v29, %v1317_v28  ;;  %v1326_v43 = vshll.u32 %v1776_v31, %v1317_v28 }
 0x2ab   :  { %v1329_v44 = vshll.u32 %v1777_v33, %v1317_v28  ;;  %v1332_v38 = vshll.u32 %v1778_v35, %v1317_v28  ;;  %vm1335_vm15 = vcmp.lt.s32.totalorder %v1316_v18, 1  ;;  %vm1338_vm0 = vcmp.lt.s32.totalorder %v1316_v18, 4 }
 0x2ac   :  { %v1321_v34 = vshrl.u32 %v1775_v29, %v1318_v19  ;;  %v1324_v41 = vshrl.u32 %v1776_v31, %v1318_v19  ;;  %v1327_v22 = vshrl.u32 %v1777_v33, %v1318_v19  ;;  %v1330_v46 = vshrl.u32 %v1778_v35, %v1318_v19 }
 0x2ad   :  { %v1333_v10 = vshrl.u32 %v1779_v42, %v1318_v19  ;;  %v1319_v45 = vshrl.u32 %v1774_v27, %v1318_v19  ;;  %vm1337_vm1 = vcmp.lt.s32.totalorder %v1316_v18, 3  ;;  %vm1336_vm2 = vcmp.lt.s32.totalorder %v1316_v18, 2 }
 0x2ae   :  { %v1322_v25 = vor.u32 %v1321_v34, %v1320_v32  ;;  %v1325_v6 = vor.u32 %v1324_v41, %v1323_v1  ;;  %v1328_v47 = vor.u32 %v1327_v22, %v1326_v43  ;;  %v1331_v40 = vor.u32 %v1330_v46, %v1329_v44 }
 0x2af   :  { %v1334_v29 = vor.u32 %v1333_v10, %v1332_v38  ;;  %v1351_v42 = vshll.u32 %v1311_v5, 8 }
 0x2b0   :  { %v1340_v48 = vsel %vm1338_vm0, %v1328_v47, 2102212464  ;;  %v1343_v31 = vsel %vm1335_vm15, %v1322_v25, %v1325_v6  ;;  %v1347_v52 = vsel %vm1335_vm15, %v1325_v6, %v1328_v47  ;;  %v1344_v33 = vsel %vm1338_vm0, %v1331_v40, 920167782 }
 0x2b1   :  { %v1348_v23 = vsel %vm1338_vm0, %v1334_v29, 1326507024  ;;  %v1345_v35 = vsel %vm1337_vm1, %v1328_v47, %v1344_v33  ;;  %v1339_v39 = vsel %vm1335_vm15, %v1319_v45, %v1322_v25  ;;  %v1341_v12 = vsel %vm1337_vm1, %v1325_v6, %v1340_v48  ;;  %v1558_v6 = vld [vmem:[%s2238_s2 + $0x2] ss:$0 sm:$0xff] }
 0x2b2   :  { %v1349_v26 = vsel %vm1337_vm1, %v1331_v40, %v1348_v23  ;;  %v1346_v54 = vsel %vm1336_vm2, %v1343_v31, %v1345_v35  ;;  %v1342_v59 = vsel %vm1336_vm2, %v1339_v39, %v1341_v12 }
 0x2b3   :  { %v1350_v58 = vsel %vm1336_vm2, %v1347_v52, %v1349_v26  ;;  %v2218_v37 = vmul.u32.u64.low %v1351_v42, %v1346_v54  ;;  %v2219_v13 = vmul.u32.u64.high %v1351_v42, %v1346_v54, %v2218_v37  ;;  %v1358_v61 = vmul.u32 %v1351_v42, %v1342_v59 }
 0x2b4   :  { %v2215_v57 = vmul.u32.u64.low %v1351_v42, %v1350_v58  ;;  %v2216_v36 = vmul.u32.u64.high %v1351_v42, %v1350_v58, %v2215_v57 }
 0x2b5   :  { %v1361_v27 = vadd.s32 1, %v2219_v13 }
 0x2b6   :  { %vm1360_vm3 = vc.u32 %v2216_v36, %v2218_v37  ;;  %v1359_v15 = vadd.s32 %v2218_v37, %v2216_v36 }
 0x2b7   :  { %v1362_v62 = vsel %vm1360_vm3, %v1361_v27, %v2219_v13 }
 0x2b8   :  { %v1363_v50 = vadd.s32 %v1362_v62, %v1358_v61 }
 0x2ba   :  { %v1364_v30 = vadd.s32 536870912, %v1363_v50 }
 0x2bc   :  { %v1365_v63 = vshrl.u32 %v1364_v30, 30 }
 0x2be   :  { %v1366_v11 = vshll.u32 %v1365_v63, 30  ;;  %v1389_v19 = vsub.s32 4, %v1365_v63 }
 0x2c0   :  { %v1367_v0 = vsub.s32 %v1363_v50, %v1366_v11  ;;  %v1390_v1 = vsel %vm1305_vm5, %v1389_v19, %v1365_v63 }
 0x2c1   :  { %v1392_v34 = vsel %vm1304_vm6, 0, %v1390_v1 }
 0x2c2   :  { %v1369_v3 = vsub.s32 0, %v1367_v0  ;;  %v1396_v41 = vadd.s32 3, %v1392_v34 }
 0x2c4   :  { %v1555_v60 = vmin.u32 %v1369_v3, %v1367_v0  ;;  %v1397_v43 = vand.u32 3, %v1396_v41 }
 0x2c6   :  { %v1371_v4 = vclz %v1555_v60  ;;  %vm1402_vm7 = vcmp.eq.s32.totalorder %v1397_v43, 2  ;;  %vm1399_vm8 = vcmp.eq.s32.totalorder %v1397_v43, 0  ;;  %vm1398_vm9 = vcmp.lt.s32.totalorder %v1397_v43, 2 }
 0x2c8   :  { %v1556_v7 = vadd.s32 4294967294, %v1371_v4 }
 0x2ca   :  { %vm1557_vm4 = vcmp.lt.s32.totalorder %v1556_v7, 0 }
 0x2cb   :  { %v1374_v49 = vsel %vm1557_vm4, 0, %v1556_v7 }
 0x2cc   :  { %v1375_v2 = vsub.s32 32, %v1374_v49  ;;  %v1379_v9 = vsub.s32 4294967266, %v1374_v49  ;;  %v1376_v55 = vshll.u32 %v1367_v0, %v1374_v49 }
 0x2ce   :  { %v1377_v24 = vshrl.u32 %v1359_v15, %v1375_v2  ;;  %v1380_v14 = vadd.s32 127, %v1379_v9 }
 0x2d0   :  { %v1378_v56 = vor.u32 %v1377_v24, %v1376_v55  ;;  %v1381_v8 = vshll.u32 %v1380_v14, 23 }
 0x2d2   :  { %v1382_v53 = vor.u32 4788187, %v1381_v8  ;;  %v1385_v21 = vcvt.s32.f32 %v1378_v56 }
 0x2d4   :  { %v1383_v20 = vand.u32 2147483647, %v1382_v53 }
 0x2d6   :  { %v1386_v28 = vmul.f32 %v1385_v21, %v1383_v20 }
 0x2d8   :  { %v1387_v51 = vxor.u32 2147483648, %v1386_v28 }
 0x2da   :  { %v1388_v18 = vsel %vm1305_vm5, %v1387_v51, %v1386_v28 }
 0x2db   :  { %v1391_v32 = vsel %vm1304_vm6, %v2198_v16, %v1388_v18 }
 0x2dc   :  { %1723 = vcosq.f32 %v1391_v32 }
 0x2dd   :  { %1725 = vsinq.f32 %v1391_v32 }
 0x2e9   :  { %v1724_v22 = vpop.eup %1723 }
 0x2ea   :  { %v1726_v44 = vpop.eup %1725  ;;  %v1403_v46 = vxor.u32 2147483648, %v1724_v22 }
 0x2eb   :  { %v1400_v38 = vxor.u32 2147483648, %v1726_v44 }
 0x2ec   :  { %v1404_v10 = vsel %vm1402_vm7, %v1403_v46, %v1726_v44 }
 0x2ed   :  { %v1401_v5 = vsel %vm1399_vm8, %v1724_v22, %v1400_v38 }
 0x2ee   :  { %v1405_v17 = vsel %vm1398_vm9, %v1401_v5, %v1404_v10 }
 0x2ef   :  { %v1406_v25 = vsel %vm1395_vm10, nan, %v1405_v17 }
 0x2f0   :  { %1661 = vmatmul.mubr.f32.vlgmr.msra.gmra.mxu1 %v1406_v25 }
 0x3b0   :  { %v1495_v47 = vpop.f32.mrf.mxu1 }
 0x3b1   :  { %v1496_v40 = vadd.f32 %v1558_v6, %v1495_v47 }
 0x3b2   :  { %v1662_v29 = vpop.f32.mrf.mxu1 }
 0x3b3   :  { %1499 = vst [vmem:[#allocation5] sm:$0xff] %v1496_v40 }
 0x3b4   :  { %1758 = shalt.err (!%p1755_p9)
}
 0x3b5   :  { %1509 = dma.vmem_to_hbm [thread:$0]  %s1507_s27, 128, %s2239_s3, [#allocation4]  }
 0x3b6   :  { %1769 = dma.done.wait [#allocation4], 128  }
 0x3b7   :  { %1770 = vsyncadd [#allocation4], 4294967168 }
 0x3b8   :  { %1513 = vsyncpa [#allocation3], 1 }
 0x3b9   :  { %1514 = vsyncpa [#allocation4], 1 }

</bundles_post_ra>
